<compile_context>
chip_gen: v7x
topology: tpu7x:2x2x1
jax: 0.10.0
libtpu: 0.0.40
codegen_flags: <defaults>
</compile_context>

<pallas_src>
import jax
import jax.numpy as jnp
from jax.experimental import pallas as pl
from jax.experimental.pallas import tpu as pltpu


LANE = 128            # TPU lane width: pad the 4-wide output to one full lane slab
DEFAULT_TILE_B = 2048 # big tiles amortize per-step overhead; still tiny vs VMEM here
MIN_TILE_B = 256      # below this, per-step overhead dominates the x DMA
MIN_GRID_STEPS = 4    # >=2 steps per TensorCore on v7x megacore sharding


def _round_up(n, m):
    return ((n + m - 1) // m) * m


def _choose_tile_b(B, requested=DEFAULT_TILE_B):
    """Batch tile: large enough to amortize per-step overhead, small enough that
    the parallel grid has >= MIN_GRID_STEPS steps when B allows (so both v7x
    TensorCores get work and the x HBM->VMEM DMA pipelines across steps)."""
    b16 = _round_up(max(B, 1), 16)  # multiple of 16: bf16 sublane packing
    # Largest tile that still yields >= MIN_GRID_STEPS steps, floored at MIN_TILE_B.
    steps_cap = max(MIN_TILE_B, 16 * (b16 // (MIN_GRID_STEPS * 16)))
    tile = min(_round_up(requested, 16), steps_cap, b16)
    return max(tile, 16)


def mlp_kernel(x_ref, w1_ref, b1_ref, w2_ref, b2_ref, add_ref, o_ref):
    # fc1: bf16 operands on the MXU, f32 accumulation; bias + ReLU in f32 (VPU).
    h = jnp.dot(x_ref[...], w1_ref[...], preferred_element_type=jnp.float32)
    h = jnp.maximum(h + b1_ref[...], 0.0)

    # fc2 (K=15): kept fused — negligible next to the 784-wide matmul.
    logits = jnp.dot(h, w2_ref[...], preferred_element_type=jnp.float32) + b2_ref[...]

    # Numerically-stable softmax over the 10 logits; approx reciprocal -> EUP slot.
    m = jnp.max(logits, axis=1, keepdims=True)
    e = jnp.exp(logits - m)
    p = e * pl.reciprocal(jnp.sum(e, axis=1, keepdims=True), approx=True)

    # Final mixing matmul; add_ref is zero-padded to 128 lanes -> lane-dense,
    # unmasked store; emit bf16 to halve the output HBM writeback.
    out = jnp.dot(p, add_ref[...], preferred_element_type=jnp.float32)
    o_ref[...] = out.astype(o_ref.dtype)


def mlp_forward(x, w1, b1, w2, b2, add_layer, tile_b=DEFAULT_TILE_B):
    B, in_features = x.shape
    hidden1 = w1.shape[1]
    hidden2, num_out = add_layer.shape

    # bf16 for the only operands with meaningful bytes (halves HBM traffic on the
    # K=784 matmul); accumulation stays f32 inside the kernel.
    x_bf = x.astype(jnp.bfloat16)
    w1_bf = w1.astype(jnp.bfloat16)

    # Lane-dense output: zero-pad the (10, 4) mixing matrix out to 128 columns.
    out_pad = _round_up(num_out, LANE)
    add_p = jnp.zeros((hidden2, out_pad), jnp.float32).at[:, :num_out].set(add_layer)

    # Tile the batch; pad rows up to a multiple of the tile size.
    tile_b = _choose_tile_b(B, tile_b)
    b_pad = _round_up(B, tile_b)
    if b_pad != B:
        x_bf = jnp.pad(x_bf, ((0, b_pad - B), (0, 0)))
    grid = (b_pad // tile_b,)

    cost = pl.CostEstimate(
        flops=2 * b_pad * (in_features * hidden1 + hidden1 * hidden2 + hidden2 * num_out),
        transcendentals=b_pad * hidden2,
        bytes_accessed=(x_bf.size * 2 + w1_bf.size * 2
                        + (b1.size + w2.size + b2.size + add_p.size) * 4
                        + b_pad * out_pad * 2),   # bf16 output writeback
    )

    out = pl.pallas_call(
        mlp_kernel,
        out_shape=jax.ShapeDtypeStruct((b_pad, out_pad), jnp.bfloat16),
        grid=grid,
        in_specs=[
            # x: tiled over batch, double-buffered by default.
            pl.BlockSpec((tile_b, in_features), lambda i: (i, 0)),
            # Grid-invariant operands: fetched once, single-buffered.
            pl.BlockSpec((in_features, hidden1), lambda i: (0, 0),
                         pipeline_mode=pl.Buffered(1)),
            pl.BlockSpec((1, hidden1), lambda i: (0, 0),
                         pipeline_mode=pl.Buffered(1)),
            pl.BlockSpec((hidden1, hidden2), lambda i: (0, 0),
                         pipeline_mode=pl.Buffered(1)),
            pl.BlockSpec((1, hidden2), lambda i: (0, 0),
                         pipeline_mode=pl.Buffered(1)),
            pl.BlockSpec((hidden2, out_pad), lambda i: (0, 0),
                         pipeline_mode=pl.Buffered(1)),
        ],
        out_specs=pl.BlockSpec((tile_b, out_pad), lambda i: (i, 0)),
        compiler_params=pltpu.CompilerParams(
            # Shard batch tiles across v7x's 2 TCs; harmless on v5e/v6e.
            dimension_semantics=("parallel",),
        ),
        cost_estimate=cost,
    )(x_bf, w1_bf, b1, w2, b2, add_p)

    # Drop batch padding (padded rows hold softmax-of-zeros garbage) and the
    # 128-lane padding; return f32 like the PyTorch module.
    return out[:B, :num_out].astype(jnp.float32)


def mlp_reference(x, w1, b1, w2, b2, add_layer, cast_bf16=False):
    if cast_bf16:
        h = jnp.dot(x.astype(jnp.bfloat16), w1.astype(jnp.bfloat16),
                    preferred_element_type=jnp.float32)
    else:
        h = x @ w1
    h = jnp.maximum(h + b1, 0.0)
    logits = h @ w2 + b2
    p = jax.nn.softmax(logits, axis=1)
    return p @ add_layer


if __name__ == "__main__":
    input_size = 784
    hidden1 = 15
    hidden2 = 10
    num_classes = 4
    batch = 512  # with the tile heuristic this runs 2 grid steps of 256 rows

    key = jax.random.PRNGKey(0)
    kx, k1, kb1, k2, kb2, ka = jax.random.split(key, 6)

    x = jax.random.normal(kx, (batch, input_size), dtype=jnp.float32)
    w1 = jax.random.normal(k1, (input_size, hidden1), dtype=jnp.float32) * 0.05
    b1 = jax.random.normal(kb1, (1, hidden1), dtype=jnp.float32) * 0.05
    w2 = jax.random.normal(k2, (hidden1, hidden2), dtype=jnp.float32) * 0.1
    b2 = jax.random.normal(kb2, (1, hidden2), dtype=jnp.float32) * 0.1
    add_layer = jax.random.normal(ka, (hidden2, num_classes), dtype=jnp.float32)

    out = jax.block_until_ready(mlp_forward(x, w1, b1, w2, b2, add_layer))
    assert out.shape == (batch, num_classes)

    # Tight check vs a reference using the same bf16 first-matmul operands
    # (remaining mismatch: approx EUP reciprocal, bf16 output cast, accum order).
    ref_bf = mlp_reference(x, w1, b1, w2, b2, add_layer, cast_bf16=True)
    assert jnp.allclose(out, ref_bf, atol=2e-2, rtol=2e-2), "mismatch vs bf16-matched reference"

    # Loose check vs the pure-f32 PyTorch-semantics reference.
    ref_f32 = mlp_reference(x, w1, b1, w2, b2, add_layer, cast_bf16=False)
    assert jnp.allclose(out, ref_f32, atol=5e-2, rtol=5e-2), "mismatch vs f32 reference"

    print("KERNEL_OK")
</pallas_src>

<mosaic_0001>
module attributes {stable_mosaic.version = 11 : i64} {
  func.func @mlp_kernel(%arg0: i32, %arg1: memref<256x784xbf16, #tpu.memory_space<vmem>>, %arg2: memref<784x15xbf16, #tpu.memory_space<vmem>>, %arg3: memref<1x15xf32, #tpu.memory_space<vmem>>, %arg4: memref<15x10xf32, #tpu.memory_space<vmem>>, %arg5: memref<1x10xf32, #tpu.memory_space<vmem>>, %arg6: memref<10x128xf32, #tpu.memory_space<vmem>>, %arg7: memref<256x128xbf16, #tpu.memory_space<vmem>>) attributes {dimension_semantics = [#tpu.dimension_semantics<parallel>], iteration_bounds = array<i64: 2>, scalar_prefetch = 0 : i64, scratch_operands = 0 : i64, tpu.core_type = #tpu.core_type<tc>, window_params = [{transform_indices = @transform_0, window_bounds = array<i64: 256, 784>}, {pipeline_mode = #tpu.pipeline_mode<synchronous>, transform_indices = @transform_1, window_bounds = array<i64: 784, 15>}, {pipeline_mode = #tpu.pipeline_mode<synchronous>, transform_indices = @transform_2, window_bounds = array<i64: 1, 15>}, {pipeline_mode = #tpu.pipeline_mode<synchronous>, transform_indices = @transform_3, window_bounds = array<i64: 15, 10>}, {pipeline_mode = #tpu.pipeline_mode<synchronous>, transform_indices = @transform_4, window_bounds = array<i64: 1, 10>}, {pipeline_mode = #tpu.pipeline_mode<synchronous>, transform_indices = @transform_5, window_bounds = array<i64: 10, 128>}, {transform_indices = @transform_6, window_bounds = array<i64: 256, 128>}]} {
    %c0 = arith.constant 0 : index
    %c0_0 = arith.constant 0 : index
    %0 = vector.load %arg1[%c0, %c0_0] : memref<256x784xbf16, #tpu.memory_space<vmem>>, vector<256x784xbf16>
    %c0_1 = arith.constant 0 : index
    %c0_2 = arith.constant 0 : index
    %1 = vector.load %arg2[%c0_1, %c0_2] : memref<784x15xbf16, #tpu.memory_space<vmem>>, vector<784x15xbf16>
    %cst = arith.constant dense<0.000000e+00> : vector<256x15xf32>
    %2 = tpu.matmul %0, %1, %cst {dimension_numbers = #tpu.dot_dimension_numbers<[1], [0], [0], [1], [0, 0, 1, 1], [], []>} : vector<256x784xbf16>, vector<784x15xbf16>, vector<256x15xf32> -> vector<256x15xf32>
    %c0_3 = arith.constant 0 : index
    %c0_4 = arith.constant 0 : index
    %3 = vector.load %arg3[%c0_3, %c0_4] : memref<1x15xf32, #tpu.memory_space<vmem>>, vector<1x15xf32>
    %4 = vector.broadcast %3 : vector<1x15xf32> to vector<256x15xf32>
    %5 = arith.addf %2, %4 : vector<256x15xf32>
    %cst_5 = arith.constant 0.000000e+00 : f32
    %6 = vector.broadcast %cst_5 : f32 to vector<256x15xf32>
    %7 = arith.maximumf %5, %6 : vector<256x15xf32>
    %c0_6 = arith.constant 0 : index
    %c0_7 = arith.constant 0 : index
    %8 = vector.load %arg4[%c0_6, %c0_7] : memref<15x10xf32, #tpu.memory_space<vmem>>, vector<15x10xf32>
    %cst_8 = arith.constant dense<0.000000e+00> : vector<256x10xf32>
    %9 = tpu.matmul %7, %8, %cst_8 {dimension_numbers = #tpu.dot_dimension_numbers<[1], [0], [0], [1], [0, 0, 1, 1], [], []>} : vector<256x15xf32>, vector<15x10xf32>, vector<256x10xf32> -> vector<256x10xf32>
    %c0_9 = arith.constant 0 : index
    %c0_10 = arith.constant 0 : index
    %10 = vector.load %arg5[%c0_9, %c0_10] : memref<1x10xf32, #tpu.memory_space<vmem>>, vector<1x10xf32>
    %11 = vector.broadcast %10 : vector<1x10xf32> to vector<256x10xf32>
    %12 = arith.addf %9, %11 : vector<256x10xf32>
    %cst_11 = arith.constant dense<0xFF800000> : vector<256xf32>
    %13 = vector.multi_reduction <maximumf>, %12, %cst_11 [1] : vector<256x10xf32> to vector<256xf32>
    %14 = vector.shape_cast %13 : vector<256xf32> to vector<256x1xf32>
    %15 = vector.broadcast %14 : vector<256x1xf32> to vector<256x10xf32>
    %16 = arith.subf %12, %15 : vector<256x10xf32>
    %17 = math.exp %16 : vector<256x10xf32>
    %cst_12 = arith.constant dense<0.000000e+00> : vector<256xf32>
    %18 = vector.multi_reduction <add>, %17, %cst_12 [1] : vector<256x10xf32> to vector<256xf32>
    %19 = vector.shape_cast %18 : vector<256xf32> to vector<256x1xf32>
    %20 = tpu.reciprocal %19 {approx = true} : vector<256x1xf32> -> vector<256x1xf32>
    %21 = vector.broadcast %20 : vector<256x1xf32> to vector<256x10xf32>
    %22 = arith.mulf %17, %21 : vector<256x10xf32>
    %c0_13 = arith.constant 0 : index
    %c0_14 = arith.constant 0 : index
    %23 = vector.load %arg6[%c0_13, %c0_14] : memref<10x128xf32, #tpu.memory_space<vmem>>, vector<10x128xf32>
    %cst_15 = arith.constant dense<0.000000e+00> : vector<256x128xf32>
    %24 = tpu.matmul %22, %23, %cst_15 {dimension_numbers = #tpu.dot_dimension_numbers<[1], [0], [0], [1], [0, 0, 1, 1], [], []>} : vector<256x10xf32>, vector<10x128xf32>, vector<256x128xf32> -> vector<256x128xf32>
    %25 = arith.truncf %24 : vector<256x128xf32> to vector<256x128xbf16>
    %c0_16 = arith.constant 0 : index
    %c0_17 = arith.constant 0 : index
    %26 = vector.load %arg7[%c0_16, %c0_17] : memref<256x128xbf16, #tpu.memory_space<vmem>>, vector<256x128xbf16>
    tpu.vector_store %arg7[%c0_16, %c0_17], %25 {strides = array<i32>} : memref<256x128xbf16, #tpu.memory_space<vmem>>, vector<256x128xbf16>,
    return
  }
  func.func @transform_0(%arg0: i32) -> (i32, i32) {
    %c0_i32 = arith.constant 0 : i32
    %c0_i32_0 = arith.constant 0 : i32
    return %arg0, %c0_i32 : i32, i32
  }
  func.func @transform_1(%arg0: i32) -> (i32, i32) {
    %c0_i32 = arith.constant 0 : i32
    %c0_i32_0 = arith.constant 0 : i32
    %c0_i32_1 = arith.constant 0 : i32
    return %c0_i32, %c0_i32_0 : i32, i32
  }
  func.func @transform_2(%arg0: i32) -> (i32, i32) {
    %c0_i32 = arith.constant 0 : i32
    %c0_i32_0 = arith.constant 0 : i32
    %c0_i32_1 = arith.constant 0 : i32
    return %c0_i32, %c0_i32_0 : i32, i32
  }
  func.func @transform_3(%arg0: i32) -> (i32, i32) {
    %c0_i32 = arith.constant 0 : i32
    %c0_i32_0 = arith.constant 0 : i32
    %c0_i32_1 = arith.constant 0 : i32
    return %c0_i32, %c0_i32_0 : i32, i32
  }
  func.func @transform_4(%arg0: i32) -> (i32, i32) {
    %c0_i32 = arith.constant 0 : i32
    %c0_i32_0 = arith.constant 0 : i32
    %c0_i32_1 = arith.constant 0 : i32
    return %c0_i32, %c0_i32_0 : i32, i32
  }
  func.func @transform_5(%arg0: i32) -> (i32, i32) {
    %c0_i32 = arith.constant 0 : i32
    %c0_i32_0 = arith.constant 0 : i32
    %c0_i32_1 = arith.constant 0 : i32
    return %c0_i32, %c0_i32_0 : i32, i32
  }
  func.func @transform_6(%arg0: i32) -> (i32, i32) {
    %c0_i32 = arith.constant 0 : i32
    %c0_i32_0 = arith.constant 0 : i32
    return %arg0, %c0_i32 : i32, i32
  }
}

</mosaic_0001>

<bundles_post_ra>
// kernel: tpu_custom_call.1
= control target key start
LH: loop header
LB: loop body
LE: loop exit
PB: predicated region body
PF: predicated region fallthrough
CT: control target
= control target key end

     0   :  { %11 = vsyncpa [#allocation3], 0  ;;  %s5873_s0 = inlined_call_operand.vmem [shape: bf16[512,784], index: 0, kind: input, shape index: {}]   ;;  %s5874_s1 = inlined_call_operand.vmem [shape: bf16[784,15], index: 1, kind: input, shape index: {}]   ;;  %s5875_s2 = inlined_call_operand.vmem [shape: f32[1,15], index: 2, kind: input, shape index: {}]   ;;  %s5876_s3 = inlined_call_operand.vmem [shape: f32[15,10], index: 3, kind: input, shape index: {}]   ;;  %s5877_s4 = inlined_call_operand.vmem [shape: f32[1,10], index: 4, kind: input, shape index: {}]   ;;  %s5878_s5 = inlined_call_operand.vmem [shape: f32[10,128], index: 5, kind: input, shape index: {}]   ;;  %s5879_s6 = inlined_call_operand.hbm [shape: bf16[512,128], index: 6, kind: output, shape index: {}]  }
   0x1   :  { %13 = vsyncpa [#allocation3 + $0x1], 0  ;;  %s4807_s21 = smov 0   ;;  %s4809_s22 = smov 0  }
   0x2   :  { %s4811_s23 = smov 0   ;;  %s4813_s24 = smov 0  }
   0x3 LB: > { %s4828_s25 = sadd.s32 4294967295, %s4766_s24   ;;  %s3320_s26 = sadd.s32 4294967294, %s4766_s24   ;;  %s4766_s24 = sphi %s4813_s24, %s5885_s24   ;;  %s4762_s23 = sphi %s4811_s23, %s5884_s23   ;;  %s4758_s22 = sphi %s4809_s22, %s5883_s22   ;;  %s4754_s21 = sphi %s4807_s21, %s5882_s21  }
   0x4   : > { %s4832_s27 = sadd.s32 1, %s4766_s24   ;;  %s157_s28 = sadd.s32 1, %s4762_s23 }
   0x5   : > { %s154_s29 = ssub.s32 %s4766_s24, %s4832_s27  ;;  %p167_p0 = scmp.ne.s32.totalorder %s4762_s23, %s4758_s22 }
   0x6   : > { %p155_p1 = scmp.eq.s32.totalorder %s154_s29, 0  ;;  %p168_p2 = scmp.eq.s32.totalorder %s4828_s25, 1 }
   0x7   : > { %p173_p3 = scmp.ne.s32.totalorder %s4758_s22, %s4754_s21  ;;  %p174_p4 = scmp.eq.s32.totalorder %s3320_s26, 1 }
   0x8   : > { %s4843_s30 = scalar_select %p155_p1, %s4762_s23, %s157_s28  }
   0x9   : > { %p4845_p5 = por %p168_p2, %p167_p0  ;;  %p4849_p6 = por %p174_p4, %p173_p3 }
   0xa   : > { %p3323_p7 = scmp.ge.s32.totalorder %s4766_s24, 1  ;;  %p217_p8 = scmp.lt.s32.totalorder %s4766_s24, 3 }
   0xc   : > { %p218_p9 = pnand %p3323_p7, %p217_p8 }
   0xd   : > { %v4367_v0 = vld [vmem:[%s5874_s1 + $0x40] sm:$0xff] (!%p218_p9)   ;;  %s3325_s11 = sshll.u32 (!%p218_p9), %s4828_s25, 5  ;;  %v4369_v2 = vld [vmem:[%s5874_s1 + $0x48] sm:$0xff] (!%p218_p9)   ;;  %v4371_v4 = vld [vmem:[%s5874_s1 + $0x50] sm:$0xff] (!%p218_p9)   ;;  %vm1344_vm0 = vcmask (!%p218_p9), 130048   ;;  %vm2175_vm1 = vcmask (!%p218_p9), 1046528  }
   0xe   : > { %221 = sbr.rel (%p218_p9) target bundleno = 1249 (0x4e1), region = 44  ;;  %v4368_v1 = vld [vmem:[%s5874_s1] sm:$0xff] (!%p218_p9)   ;;  %3737 = vmatprep.subr.bf16.mxu0 (!%p218_p9), %v4367_v0  ;;  %4308 = vmatprep.subr.bf16.mxu1 (!%p218_p9), %v4367_v0  ;;  %p249_p10 = scmp.lt.s32.totalorder (!%p218_p9), %s3325_s11, 63  ;;  %v4370_v3 = vld [vmem:[%s5874_s1 + $0x8] sm:$0xff] (!%p218_p9)   ;;  %v4372_v5 = vld [vmem:[%s5874_s1 + $0x10] sm:$0xff] (!%p218_p9)   ;;  %vm4768_vm2 = vmmov (!%p218_p9), 1  }
   0xf   : > { %3738 = vmatpush3.bf16.msra.mxu0 (!%p218_p9), %v4368_v1  ;;  %4316 = vmatpush3.bf16.msra.mxu1 (!%p218_p9), %v4368_v1  ;;  %v4373_v6 = vld [vmem:[%s5874_s1 + $0x58] sm:$0xff] (!%p218_p9)   ;;  %v4375_v8 = vld [vmem:[%s5874_s1 + $0x60] sm:$0xff] (!%p218_p9)   ;;  %v4377_v10 = vld [vmem:[%s5874_s1 + $0x68] sm:$0xff] (!%p218_p9)   ;;  %vm2078_vm4 = vcmask (!%p218_p9), 121856   ;;  %vm2404_vm5 = vcmask (!%p218_p9), 80896   ;;  %vm2855_vm6 = vcmask (!%p218_p9), 1041408  }
  0x10   : > { %3739 = vmatprep.subr.bf16.mxu0 (!%p218_p9), %v4369_v2  ;;  %4309 = vmatprep.subr.bf16.mxu1 (!%p218_p9), %v4369_v2  ;;  %v4374_v7 = vld [vmem:[%s5874_s1 + $0x18] sm:$0xff] (!%p218_p9)   ;;  %v4376_v9 = vld [vmem:[%s5874_s1 + $0x20] sm:$0xff] (!%p218_p9)   ;;  %v4378_v13 = vld [vmem:[%s5874_s1 + $0x28] sm:$0xff] (!%p218_p9)   ;;  %s3641_s13 = sshll.u32 (!%p218_p9), %s4828_s25, 11  ;;  %s4769_s18 = smov (!%p218_p9), [#allocation2]  }
  0x11   : > { %v4379_v14 = vld [vmem:[%s5874_s1 + $0x70] sm:$0xff] (!%p218_p9)   ;;  %v4381_v16 = vld [vmem:[%s5874_s1 + $0x78] sm:$0xff] (!%p218_p9)   ;;  %v4389_v18 = vld [vmem:[%s5874_s1 + $0xc0] sm:$0xff] (!%p218_p9)   ;;  %s4708_s19 = sshll.u32 (!%p218_p9), %s4769_s18, 4  ;;  %s4709_s19 = int_to_ptr.vmem [resolvable:$false] %s4708_s19 }
  0x12   : > { %v4380_v15 = vld [vmem:[%s5874_s1 + $0x30] sm:$0xff] (!%p218_p9)   ;;  %v4382_v17 = vld [vmem:[%s5874_s1 + $0x38] sm:$0xff] (!%p218_p9)   ;;  %v4391_v21 = vld [vmem:[%s5874_s1 + $0x140] sm:$0xff] (!%p218_p9)   ;;  %s4710_s20 = scalar_lea.vmem (!%p218_p9), %s4709_s19, 4096 }
  0x13   : > { %3740 = vmatpush3.bf16.msra.mxu0 (!%p218_p9), %v4370_v3  ;;  %4317 = vmatpush3.bf16.msra.mxu1 (!%p218_p9), %v4370_v3  ;;  %v4390_v22 = vld [vmem:[%s5874_s1 + $0x80] sm:$0xff] (!%p218_p9)   ;;  %v4392_v23 = vld [vmem:[%s5874_s1 + $0xc8] sm:$0xff] (!%p218_p9)   ;;  %v4401_v29 = vld [vmem:[%s5874_s1 + $0xd0] sm:$0xff] (!%p218_p9)  }
  0x14   : > { %3741 = vmatprep.subr.bf16.mxu0 (!%p218_p9), %v4371_v4  ;;  %4310 = vmatprep.subr.bf16.mxu1 (!%p218_p9), %v4371_v4  ;;  %v4393_v24 = vld [vmem:[%s5874_s1 + $0x100] sm:$0xff] (!%p218_p9)   ;;  %v4394_v27 = vld [vmem:[%s5874_s1 + $0x88] sm:$0xff] (!%p218_p9)   ;;  %v4402_v33 = vld [vmem:[%s5874_s1 + $0x90] sm:$0xff] (!%p218_p9)  }
  0x15   : > { %s5887_s11 = smov (!%p249_p10, %s3325_s11), 63  ;;  %v4409_v28 = vld [vmem:[%s5874_s1 + $0x148] sm:$0xff]   ;;  %v4403_v34 = vld [vmem:[%s5874_s1 + $0xd8] sm:$0xff]   ;;  %v4412_v40 = vld [vmem:[%s5874_s1 + $0xe0] sm:$0xff]  }
  0x16   : > { %s4324_s9 = smul.u32 28, %s5887_s11  ;;  %v4413_v32 = vld [vmem:[%s5874_s1 + $0x108] sm:$0xff]   ;;  %v4404_v37 = vld [vmem:[%s5874_s1 + $0x98] sm:$0xff]   ;;  %v4414_v41 = vld [vmem:[%s5874_s1 + $0xa0] sm:$0xff]  }
  0x17   : > { %3742 = vmatpush3.bf16.msra.mxu0 %v4372_v5  ;;  %4318 = vmatpush3.bf16.msra.mxu1 %v4372_v5  ;;  %v4425_v42 = vld [vmem:[%s5874_s1 + $0x150] sm:$0xff]   ;;  %v4415_v43 = vld [vmem:[%s5874_s1 + $0xe8] sm:$0xff]   ;;  %v4426_v52 = vld [vmem:[%s5874_s1 + $0xf8] sm:$0xff]  }
  0x18   : > { %3743 = vmatprep.subr.bf16.mxu0 %v4373_v6  ;;  %4311 = vmatprep.subr.bf16.mxu1 %v4373_v6  ;;  %s4886_s17 = scalar_lea.vmem %s5873_s0, %s4324_s9  ;;  %v4427_v45 = vld [vmem:[%s5874_s1 + $0x110] sm:$0xff]   ;;  %v4416_v47 = vld [vmem:[%s5874_s1 + $0xa8] sm:$0xff]   ;;  %v4440_v54 = vld [vmem:[%s5874_s1 + $0x158] sm:$0xff]   ;;  %s245_s9 = sand.u32 1, %s4758_s22  }
  0x19   : > { %v4385_v11 = vld [vmem:[%s4886_s17 + $0x4] ss:$28 sps:$4 sm:$0xff]   ;;  %v4395_v25 = vld [vmem:[%s4886_s17 + $0x3c] ss:$28 sps:$4 sm:$0xff]   ;;  %v4405_v35 = vld [vmem:[%s4886_s17 + $0x74] ss:$28 sps:$4 sm:$0xff]  }
  0x1a   : > { %v4388_v12 = vld [vmem:[%s4886_s17 + $0x2a4] ss:$28 sps:$4 sm:$0xff]   ;;  %1425 = vmatprep.mubr.bf16.mxu0 %v4385_v11  ;;  %v4397_v26 = vld [vmem:[%s4886_s17 + $0x2dc] ss:$28 sps:$4 sm:$0xff]   ;;  %v4407_v36 = vld [vmem:[%s4886_s17 + $0x314] ss:$28 sps:$4 sm:$0xff]  }
  0x1b   : > { %3744 = vmatpush3.bf16.msra.mxu0 %v4374_v7  ;;  %4319 = vmatpush3.bf16.msra.mxu1 %v4374_v7  ;;  %v4383_v19 = vld [vmem:[%s4886_s17] ss:$28 sps:$4 sm:$0xff]   ;;  %v4399_v30 = vld [vmem:[%s4886_s17 + $0x38] ss:$28 sps:$4 sm:$0xff]   ;;  %v4410_v38 = vld [vmem:[%s4886_s17 + $0x70] ss:$28 sps:$4 sm:$0xff]  }
  0x1c   : > { %3745 = vmatprep.subr.bf16.mxu0 %v4375_v8  ;;  %4312 = vmatprep.subr.bf16.mxu1 %v4375_v8  ;;  %v4386_v20 = vld [vmem:[%s4886_s17 + $0x2a0] ss:$28 sps:$4 sm:$0xff]   ;;  %v4400_v31 = vld [vmem:[%s4886_s17 + $0x2d8] ss:$28 sps:$4 sm:$0xff]   ;;  %v4411_v39 = vld [vmem:[%s4886_s17 + $0x310] ss:$28 sps:$4 sm:$0xff]  }
  0x1d   : > { %1521 = vmatprep.mubr.bf16.mxu1 %v4388_v12  ;;  %v4417_v44 = vld [vmem:[%s4886_s17 + $0xac] ss:$28 sps:$4 sm:$0xff]   ;;  %v4423_v49 = vld [vmem:[%s5874_s1 + $0xf0] sm:$0xff]   ;;  %v4429_v53 = vld [vmem:[%s4886_s17 + $0xe4] ss:$28 sps:$4 sm:$0xff]   ;;  %s3324_s10 = sshll.u32 %s245_s9, 7 }
  0x1e   : > { %v4419_v46 = vld [vmem:[%s4886_s17 + $0x34c] ss:$28 sps:$4 sm:$0xff]   ;;  %v4424_v51 = vld [vmem:[%s5874_s1 + $0xb0] sm:$0xff]   ;;  %v4443_v56 = vld [vmem:[%s5874_s1 + $0x118] sm:$0xff]   ;;  %s5803_s12 = scalar_lea.vmem [#allocation2], %s3324_s10  ;;  %s5832_s11 = scalar_lea.sflag [#allocation3], %s245_s9 }
  0x1f   : > { %3746 = vmatpush3.bf16.msra.mxu0 %v4376_v9  ;;  %4320 = vmatpush3.bf16.msra.mxu1 %v4376_v9  ;;  %v4421_v48 = vld [vmem:[%s4886_s17 + $0xa8] ss:$28 sps:$4 sm:$0xff]   ;;  %v4428_v57 = vld [vmem:[%s5874_s1 + $0xb8] sm:$0xff]   ;;  %v4444_v5 = vld [vmem:[%s4886_s17 + $0x154] ss:$28 sps:$4 sm:$0xff]   ;;  %s3258_s14 = sshll.u32 %s5803_s12, 4  ;;  %s5827_s14 = int_to_ptr.vmem [resolvable:$true] %s3258_s14 }
  0x20   : > { %3747 = vmatprep.subr.bf16.mxu0 %v4377_v10  ;;  %4313 = vmatprep.subr.bf16.mxu1 %v4377_v10  ;;  %v4422_v50 = vld [vmem:[%s4886_s17 + $0x348] ss:$28 sps:$4 sm:$0xff]   ;;  %v4434_v62 = vld [vmem:[%s4886_s17 + $0xe0] ss:$28 sps:$4 sm:$0xff]   ;;  %v4441_v3 = vld [vmem:[%s4886_s17 + $0x118] ss:$28 sps:$4 sm:$0xff]   ;;  %p4711_p0 = scmp.lt.s32.totalorder %s5827_s14, %s4709_s19 }
  0x21   : > { %v4433_v55 = vld [vmem:[%s4886_s17 + $0xc] ss:$28 sps:$4 sm:$0xff]   ;;  %v4435_v58 = vld [vmem:[%s5874_s1 + $0x180] sm:$0xff]   ;;  %v4436_v63 = vld [vmem:[%s4886_s17 + $0x11c] ss:$28 sps:$4 sm:$0xff]   ;;  %s4704_s25 = scalar_lea.vmem %s5827_s14, 2048 }
  0x22   : > { %v4431_v59 = vld [vmem:[%s4886_s17 + $0x8] ss:$28 sps:$4 sm:$0xff]   ;;  %v4442_v4 = vld [vmem:[%s4886_s17 + $0x40] ss:$28 sps:$4 sm:$0xff]   ;;  %v4472_v7 = vld [vmem:[%s5874_s1 + $0x170] sm:$0xff]   ;;  %p4705_p11 = scmp.ne.s32.totalorder %s5827_s14, %s4704_s25  ;;  %p4712_p1 = scmp.lt.s32.totalorder %s4710_s20, %s4704_s25 }
  0x23   : > { %3748 = vmatpush3.bf16.msra.mxu0 %v4378_v13  ;;  %4321 = vmatpush3.bf16.msra.mxu1 %v4378_v13  ;;  %v4450_v60 = vld [vmem:[%s5874_s1 + $0x160] sm:$0xff]   ;;  %v4462_v1 = vld [vmem:[%s5874_s1 + $0x168] sm:$0xff]   ;;  %v4446_v6 = vld [vmem:[%s4886_s17 + $0x7c] ss:$28 sps:$4 sm:$0xff]  }
  0x24   : > { %3749 = vmatprep.subr.bf16.mxu0 %v4379_v14  ;;  %4314 = vmatprep.subr.bf16.mxu1 %v4379_v14  ;;  %v4451_v61 = vld [vmem:[%s5874_s1 + $0x120] sm:$0xff]   ;;  %v4465_v2 = vld [vmem:[%s5874_s1 + $0x128] sm:$0xff]   ;;  %v4473_v8 = vld [vmem:[%s5874_s1 + $0x130] sm:$0xff]   ;;  %p4706_p12 = pnand %p4705_p11, %p4845_p5  ;;  %p4713_p2 = por %p4712_p1, %p4711_p0 }
  0x25   : > { %v4438_v0 = vld [vmem:[%s4886_s17 + $0x44] ss:$28 sps:$4 sm:$0xff]   ;;  %v4448_v9 = vld [vmem:[%s4886_s17 + $0x150] ss:$28 sps:$4 sm:$0xff]   ;;  %v4449_v10 = vld [vmem:[%s4886_s17 + $0x78] ss:$28 sps:$4 sm:$0xff]  }
  0x26   : > { %v4452_v11 = vld [vmem:[%s4886_s17 + $0x18c] ss:$28 sps:$4 sm:$0xff]   ;;  %v4454_v12 = vld [vmem:[%s4886_s17 + $0xb4] ss:$28 sps:$4 sm:$0xff]   ;;  %v4484_v13 = vld [vmem:[%s5874_s1 + $0x178] sm:$0xff]   ;;  %p4707_p13 = pneg %p4706_p12 }
  0x27   : > { %3750 = vmatpush3.bf16.msra.mxu0 %v4380_v15  ;;  %4322 = vmatpush3.bf16.msra.mxu1 %v4380_v15  ;;  %v4487_v14 = vld [vmem:[%s5874_s1 + $0x138] sm:$0xff]   ;;  %v4456_v15 = vld [vmem:[%s4886_s17 + $0x188] ss:$28 sps:$4 sm:$0xff]   ;;  %vm4297_vm3 = vmpackc.low %vm2175_vm1, %vm4768_vm2 }
  0x28   : > { %3751 = vmatprep.subr.bf16.mxu0 %v4381_v16  ;;  %4315 = vmatprep.subr.bf16.mxu1 %v4381_v16  ;;  %v4457_v16 = vld [vmem:[%s4886_s17 + $0xb0] ss:$28 sps:$4 sm:$0xff]   ;;  %vm4303_vm7 = vmpackc.low %vm2855_vm6, %vm4768_vm2  ;;  %p4714_p3 = pnand %p4713_p2, %p4707_p13 }
  0x2b   : > { %3752 = vmatpush3.bf16.msra.mxu0 %v4382_v17  ;;  %4323 = vmatpush3.bf16.msra.mxu1 %v4382_v17  ;;  %v4458_v17 = vld [vmem:[%s4886_s17 + $0x1c4] ss:$28 sps:$4 sm:$0xff]  }
  0x2c   : > { %3849 = vmatprep.subr.bf16.mxu1 %v4389_v18  ;;  %3961 = vmatprep.subr.bf16.mxu0 %v4391_v21  ;;  %v4460_v18 = vld [vmem:[%s4886_s17 + $0xec] ss:$28 sps:$4 sm:$0xff]   ;;  %v4466_v21 = vld [vmem:[%s4886_s17 + $0x1fc] ss:$28 sps:$4 sm:$0xff]  }
  0x2e   : > { %1426 = vmatmul.mubr.bf16.vlgmr.msra.gmra.mrb[0].mxu0 %v4383_v19  ;;  %1522 = vmatmul.mubr.bf16.vlgmr.msra.gmra.mrb[0].mxu1 %v4386_v20  ;;  %v4463_v19 = vld [vmem:[%s4886_s17 + $0x1c0] ss:$28 sps:$4 sm:$0xff]   ;;  %v4464_v20 = vld [vmem:[%s4886_s17 + $0xe8] ss:$28 sps:$4 sm:$0xff]  }
  0x2f   : > { %3850 = vmatpush3.bf16.msra.mxu1 %v4390_v22  ;;  %3962 = vmatpush3.bf16.msra.mxu0 %v4393_v24  ;;  %v4468_v22 = vld [vmem:[%s4886_s17 + $0x124] ss:$28 sps:$4 sm:$0xff]  }
  0x30   : > { %3851 = vmatprep.subr.bf16.mxu1 %v4392_v23  ;;  %1433 = vmatprep.mubr.bf16.mxu0 %v4395_v25  ;;  %v4470_v23 = vld [vmem:[%s4886_s17 + $0x1f8] ss:$28 sps:$4 sm:$0xff]   ;;  %v4471_v24 = vld [vmem:[%s4886_s17 + $0x120] ss:$28 sps:$4 sm:$0xff]  }
  0x31   : > { %1529 = vmatprep.mubr.bf16.mxu1 %v4397_v26  ;;  %3963 = vmatprep.subr.bf16.mxu0 %v4409_v28  ;;  %v4474_v25 = vld [vmem:[%s4886_s17 + $0x234] ss:$28 sps:$4 sm:$0xff]   ;;  %v4476_v26 = vld [vmem:[%s4886_s17 + $0x15c] ss:$28 sps:$4 sm:$0xff]  }
  0x32   : > { %v4479_v28 = vld [vmem:[%s4886_s17 + $0x158] ss:$28 sps:$4 sm:$0xff]  }
  0x33   : > { %3852 = vmatpush3.bf16.msra.mxu1 %v4394_v27  ;;  %3964 = vmatpush3.bf16.msra.mxu0 %v4413_v32  ;;  %v4478_v27 = vld [vmem:[%s4886_s17 + $0x230] ss:$28 sps:$4 sm:$0xff]  }
  0x34   : > { %3853 = vmatprep.subr.bf16.mxu1 %v4401_v29  ;;  %3965 = vmatprep.subr.bf16.mxu0 %v4425_v42  ;;  %v4480_v29 = vld [vmem:[%s4886_s17 + $0x26c] ss:$28 sps:$4 sm:$0xff]   ;;  %v4502_v42 = vld [vmem:[%s4886_s17 + $0x84] ss:$28 sps:$4 sm:$0xff]  }
  0x35   : > { %v4486_v32 = vld [vmem:[%s4886_s17 + $0x190] ss:$28 sps:$4 sm:$0xff]  }
  0x36   : > { %1434 = vmatmul.mubr.bf16.gmra.mrb[4].mxu0 %v4399_v30  ;;  %1530 = vmatmul.mubr.bf16.gmra.mrb[4].mxu1 %v4400_v31  ;;  %v4482_v30 = vld [vmem:[%s4886_s17 + $0x194] ss:$28 sps:$4 sm:$0xff]   ;;  %v4485_v31 = vld [vmem:[%s4886_s17 + $0x268] ss:$28 sps:$4 sm:$0xff]  }
  0x37   : > { %3854 = vmatpush3.bf16.msra.mxu1 %v4402_v33  ;;  %1441 = vmatprep.mubr.bf16.mxu0 %v4405_v35  ;;  %v4488_v33 = vld [vmem:[%s4886_s17 + $0x1cc] ss:$28 sps:$4 sm:$0xff]  }
  0x38   : > { %3855 = vmatprep.subr.bf16.mxu1 %v4403_v34  ;;  %1537 = vmatprep.mubr.bf16.mxu1 %v4407_v36  ;;  %v4492_v34 = vld [vmem:[%s4886_s17 + $0x14] ss:$28 sps:$4 sm:$0xff]   ;;  %v4493_v36 = vld [vmem:[%s4886_s17 + $0x1c8] ss:$28 sps:$4 sm:$0xff]  }
  0x39   : > { %3966 = vmatpush3.bf16.msra.mxu0 %v4427_v45  ;;  %v4490_v35 = vld [vmem:[%s4886_s17 + $0x10] ss:$28 sps:$4 sm:$0xff]  }
  0x3a   : > { %3967 = vmatprep.subr.bf16.mxu0 %v4440_v54  ;;  %v4506_v45 = vld [vmem:[%s4886_s17 + $0x274] ss:$28 sps:$4 sm:$0xff]   ;;  %v4520_v54 = vld [vmem:[%s4886_s17 + $0x12c] ss:$28 sps:$4 sm:$0xff]  }
  0x3b   : > { %3856 = vmatpush3.bf16.msra.mxu1 %v4404_v37  ;;  %v4494_v37 = vld [vmem:[%s4886_s17 + $0x204] ss:$28 sps:$4 sm:$0xff]  }
  0x3c   : > { %3857 = vmatprep.subr.bf16.mxu1 %v4412_v40  ;;  %v4499_v40 = vld [vmem:[%s4886_s17 + $0x48] ss:$28 sps:$4 sm:$0xff]  }
  0x3d   : > { %3968 = vmatpush3.bf16.msra.mxu0 %v4443_v56  ;;  %v4523_v56 = vld [vmem:[%s4886_s17 + $0x128] ss:$28 sps:$4 sm:$0xff]  }
  0x3e   : > { %1442 = vmatmul.mubr.bf16.gmra.mrb[8].mxu0 %v4410_v38  ;;  %1538 = vmatmul.mubr.bf16.gmra.mrb[8].mxu1 %v4411_v39  ;;  %v4496_v38 = vld [vmem:[%s4886_s17 + $0x4c] ss:$28 sps:$4 sm:$0xff]   ;;  %v4498_v39 = vld [vmem:[%s4886_s17 + $0x200] ss:$28 sps:$4 sm:$0xff]  }
  0x3f   : > { %3858 = vmatpush3.bf16.msra.mxu1 %v4414_v41  ;;  %1449 = vmatprep.mubr.bf16.mxu0 %v4417_v44  ;;  %v4500_v41 = vld [vmem:[%s4886_s17 + $0x23c] ss:$28 sps:$4 sm:$0xff]  }
  0x40   : > { %3859 = vmatprep.subr.bf16.mxu1 %v4415_v43  ;;  %1545 = vmatprep.mubr.bf16.mxu1 %v4419_v46  ;;  %v4504_v43 = vld [vmem:[%s4886_s17 + $0x238] ss:$28 sps:$4 sm:$0xff]   ;;  %v4505_v44 = vld [vmem:[%s4886_s17 + $0x80] ss:$28 sps:$4 sm:$0xff]  }
  0x41   : > { %3969 = vmatprep.subr.bf16.mxu0 %v4450_v60  ;;  %v4508_v46 = vld [vmem:[%s4886_s17 + $0xbc] ss:$28 sps:$4 sm:$0xff]  }
  0x42   : > { %3970 = vmatpush3.bf16.msra.mxu0 %v4451_v61  ;;  %v4529_v60 = vld [vmem:[%s4886_s17 + $0x160] ss:$28 sps:$4 sm:$0xff]   ;;  %v4530_v61 = vld [vmem:[%s4886_s17 + $0x354] ss:$28 sps:$4 sm:$0xff]  }
  0x43   : > { %3860 = vmatpush3.bf16.msra.mxu1 %v4416_v47  ;;  %3971 = vmatprep.subr.bf16.mxu0 %v4462_v1  ;;  %v4510_v47 = vld [vmem:[%s4886_s17 + $0x270] ss:$28 sps:$4 sm:$0xff]  }
  0x44   : > { %3861 = vmatprep.subr.bf16.mxu1 %v4423_v49  ;;  %v4512_v49 = vld [vmem:[%s4886_s17 + $0x2ac] ss:$28 sps:$4 sm:$0xff]   ;;  %v4536_v1 = vld [vmem:[%s4886_s17 + $0x1d4] ss:$28 sps:$4 sm:$0xff]  }
  0x46   : > { %1450 = vmatmul.mubr.bf16.gmra.mrb[12].mxu0 %v4421_v48  ;;  %1546 = vmatmul.mubr.bf16.gmra.mrb[12].mxu1 %v4422_v50  ;;  %v4511_v48 = vld [vmem:[%s4886_s17 + $0xb8] ss:$28 sps:$4 sm:$0xff]  }
  0x47   : > { %3862 = vmatpush3.bf16.msra.mxu1 %v4424_v51  ;;  %1457 = vmatprep.mubr.bf16.mxu0 %v4429_v53  ;;  %v4514_v50 = vld [vmem:[%s4886_s17 + $0xf4] ss:$28 sps:$4 sm:$0xff]   ;;  %v4516_v51 = vld [vmem:[%s4886_s17 + $0x2a8] ss:$28 sps:$4 sm:$0xff]  }
  0x48   : > { %3863 = vmatprep.subr.bf16.mxu1 %v4426_v52  ;;  %1586 = vmatprep.mubr.bf16.mxu1 %v4433_v55  ;;  %v4517_v52 = vld [vmem:[%s4886_s17 + $0xf0] ss:$28 sps:$4 sm:$0xff]   ;;  %v4518_v53 = vld [vmem:[%s4886_s17 + $0x2e4] ss:$28 sps:$4 sm:$0xff]  }
  0x49   : > { %3972 = vmatpush3.bf16.msra.mxu0 %v4465_v2  ;;  %v4522_v55 = vld [vmem:[%s4886_s17 + $0x2e0] ss:$28 sps:$4 sm:$0xff]   ;;  %v4538_v2 = vld [vmem:[%s4886_s17 + $0x18] ss:$28 sps:$4 sm:$0xff]  }
  0x4a   : > { %3973 = vmatprep.subr.bf16.mxu0 %v4472_v7  ;;  %v4544_v7 = vld [vmem:[%s4886_s17 + $0x208] ss:$28 sps:$4 sm:$0xff]  }
  0x4b   : > { %3864 = vmatpush3.bf16.msra.mxu1 %v4428_v57  ;;  %v4524_v57 = vld [vmem:[%s4886_s17 + $0x31c] ss:$28 sps:$4 sm:$0xff]  }
  0x4c   : > { %4158 = vmatprep.subr.bf16.mxu1 %v4435_v58 }
  0x4d   : > { %3974 = vmatpush3.bf16.msra.mxu0 %v4473_v8  ;;  %v4545_v8 = vld [vmem:[%s4886_s17 + $0xc0] ss:$28 sps:$4 sm:$0xff]  }
  0x4e   : > { %1458 = vmatmul.mubr.bf16.gmra.mrb[16].mxu0 %v4434_v62  ;;  %1587 = vmatmul.mubr.bf16.vlgmr.msra.gmra.mrb[16].mxu1 %v4431_v59  ;;  %v4528_v59 = vld [vmem:[%s4886_s17 + $0x318] ss:$28 sps:$4 sm:$0xff]  }
  0x4f   : > { %4159 = vmatpush3.bf16.msra.mxu1 %v4435_v58  ;;  %1465 = vmatprep.mubr.bf16.mxu0 %v4436_v63  ;;  %v4526_v58 = vld [vmem:[%s4886_s17 + $0x164] ss:$28 sps:$4 sm:$0xff]   ;;  %v4532_v62 = vld [vmem:[%s4886_s17 + $0x19c] ss:$28 sps:$4 sm:$0xff]   ;;  %v4534_v63 = vld [vmem:[%s4886_s17 + $0x350] ss:$28 sps:$4 sm:$0xff]  }
  0x50   : > { %1594 = vmatprep.mubr.bf16.mxu1 %v4438_v0  ;;  %3975 = vmatprep.subr.bf16.mxu0 %v4484_v13  ;;  %v4535_v0 = vld [vmem:[%s4886_s17 + $0x198] ss:$28 sps:$4 sm:$0xff]  }
  0x51   : > { %3976 = vmatpush3.bf16.msra.mxu0 %v4487_v14  ;;  %v4551_v13 = vld [vmem:[%s4886_s17 + $0x27c] ss:$28 sps:$4 sm:$0xff]   ;;  %v4553_v14 = vld [vmem:[%s4886_s17 + $0x168] ss:$28 sps:$4 sm:$0xff]  }
  0x56   : > { %1466 = vmatmul.mubr.bf16.gmra.mrb[20].mxu0 %v4441_v3  ;;  %1595 = vmatmul.mubr.bf16.gmra.mrb[20].mxu1 %v4442_v4  ;;  %v4539_v3 = vld [vmem:[%s4886_s17 + $0x1d0] ss:$28 sps:$4 sm:$0xff]  }
  0x57   : > { %1473 = vmatprep.mubr.bf16.mxu0 %v4444_v5  ;;  %1602 = vmatprep.mubr.bf16.mxu1 %v4446_v6  ;;  %v4540_v4 = vld [vmem:[%s4886_s17 + $0x50] ss:$28 sps:$4 sm:$0xff]   ;;  %v4543_v6 = vld [vmem:[%s4886_s17 + $0x88] ss:$28 sps:$4 sm:$0xff]  }
  0x58   : > { %v4541_v5 = vld [vmem:[%s4886_s17 + $0x20c] ss:$28 sps:$4 sm:$0xff]  }
  0x5e   : > { %1474 = vmatmul.mubr.bf16.gmra.mrb[24].mxu0 %v4448_v9  ;;  %1603 = vmatmul.mubr.bf16.gmra.mrb[24].mxu1 %v4449_v10  ;;  %v4546_v9 = vld [vmem:[%s4886_s17 + $0x244] ss:$28 sps:$4 sm:$0xff]   ;;  %v4548_v10 = vld [vmem:[%s4886_s17 + $0xf8] ss:$28 sps:$4 sm:$0xff]  }
  0x5f   : > { %1481 = vmatprep.mubr.bf16.mxu0 %v4452_v11  ;;  %1610 = vmatprep.mubr.bf16.mxu1 %v4454_v12  ;;  %v4549_v11 = vld [vmem:[%s4886_s17 + $0x240] ss:$28 sps:$4 sm:$0xff]   ;;  %v4550_v12 = vld [vmem:[%s4886_s17 + $0x130] ss:$28 sps:$4 sm:$0xff]  }
  0x66   : > { %1482 = vmatmul.mubr.bf16.gmra.mrb[28].mxu0 %v4456_v15  ;;  %1611 = vmatmul.mubr.bf16.gmra.mrb[28].mxu1 %v4457_v16  ;;  %v4554_v15 = vld [vmem:[%s4886_s17 + $0x278] ss:$28 sps:$4 sm:$0xff]   ;;  %v4555_v16 = vld [vmem:[%s4886_s17 + $0x1a0] ss:$28 sps:$4 sm:$0xff]  }
  0x67   : > { %1489 = vmatprep.mubr.bf16.mxu0 %v4458_v17  ;;  %1618 = vmatprep.mubr.bf16.mxu1 %v4460_v18  ;;  %v4556_v17 = vld [vmem:[%s4886_s17 + $0x2b4] ss:$28 sps:$4 sm:$0xff]  }
  0x68   : > { %v4558_v18 = vld [vmem:[%s4886_s17 + $0x1d8] ss:$28 sps:$4 sm:$0xff]  }
  0x6e   : > { %1490 = vmatmul.mubr.bf16.gmra.mrb[32].mxu0 %v4463_v19  ;;  %1619 = vmatmul.mubr.bf16.gmra.mrb[32].mxu1 %v4464_v20  ;;  %v2069_v19 = vld [vmem:[%s5876_s3] sm:$0xff]  ;;  %v2070_v20 = vld [vmem:[%s5876_s3 + $0x8] sm:$0x7f] }
  0x6f   : > { %1497 = vmatprep.mubr.bf16.mxu0 %v4466_v21  ;;  %1626 = vmatprep.mubr.bf16.mxu1 %v4468_v22  ;;  %v4559_v21 = vld [vmem:[%s4886_s17 + $0x2b0] ss:$28 sps:$4 sm:$0xff]  }
  0x70   : > { %v4560_v22 = vld [vmem:[%s4886_s17 + $0x210] ss:$28 sps:$4 sm:$0xff]  }
  0x76   : > { %1498 = vmatmul.mubr.bf16.gmra.mrb[36].mxu0 %v4470_v23  ;;  %1627 = vmatmul.mubr.bf16.gmra.mrb[36].mxu1 %v4471_v24  ;;  %v4296_v23 = vpack.c.bf16 %v2070_v20, %v2069_v19  ;;  %v4561_v24 = vld [vmem:[%s4886_s17 + $0x2ec] ss:$28 sps:$4 sm:$0xff]  }
  0x77   : > { %1505 = vmatprep.mubr.bf16.mxu0 %v4474_v25  ;;  %1634 = vmatprep.mubr.bf16.mxu1 %v4476_v26  ;;  %v4563_v25 = vld [vmem:[%s4886_s17 + $0x248] ss:$28 sps:$4 sm:$0xff]  }
  0x78   : > { %4298 = vmatprep.subr.msk.bf16.mxu1 %vm4297_vm3, %v4296_v23  ;;  %v4564_v26 = vld [vmem:[%s4886_s17 + $0x2e8] ss:$28 sps:$4 sm:$0xff]  }
  0x7e   : > { %1506 = vmatmul.mubr.bf16.gmra.mrb[40].mxu0 %v4478_v27  ;;  %1635 = vmatmul.mubr.bf16.gmra.mrb[40].mxu1 %v4479_v28  ;;  %v4565_v27 = vld [vmem:[%s4886_s17 + $0x280] ss:$28 sps:$4 sm:$0xff]  }
  0x7f   : > { %1513 = vmatprep.mubr.bf16.mxu0 %v4480_v29  ;;  %1642 = vmatprep.mubr.bf16.mxu1 %v4482_v30  ;;  %v4566_v28 = vld [vmem:[%s4886_s17 + $0x324] ss:$28 sps:$4 sm:$0xff]   ;;  %v4568_v29 = vld [vmem:[%s4886_s17 + $0x2b8] ss:$28 sps:$4 sm:$0xff]  }
  0x80   : > { %v4569_v30 = vld [vmem:[%s4886_s17 + $0x320] ss:$28 sps:$4 sm:$0xff]  }
  0x86   : > { %1514 = vmatmul.mubr.bf16.gmra.mrb[44].mxu0 %v4485_v31  ;;  %1643 = vmatmul.mubr.bf16.gmra.mrb[44].mxu1 %v4486_v32  ;;  %v4570_v31 = vld [vmem:[%s4886_s17 + $0x2f0] ss:$28 sps:$4 sm:$0xff]   ;;  %v4571_v32 = vld [vmem:[%s4886_s17 + $0x35c] ss:$28 sps:$4 sm:$0xff]  }
  0x87   : > { %1650 = vmatprep.mubr.bf16.mxu1 %v4488_v33  ;;  %1747 = vmatprep.mubr.bf16.mxu0 %v4492_v34  ;;  %v4573_v33 = vld [vmem:[%s4886_s17 + $0x328] ss:$28 sps:$4 sm:$0xff]  }
  0x8e   : > { %1651 = vmatmul.mubr.bf16.gmra.mrb[48].mxu1 %v4493_v36  ;;  %1748 = vmatmul.mubr.bf16.vlgmr.msra.gmra.mrb[48].mxu0 %v4490_v35 }
  0x8f   : > { %1658 = vmatprep.mubr.bf16.mxu1 %v4494_v37  ;;  %1755 = vmatprep.mubr.bf16.mxu0 %v4496_v38  ;;  %v4574_v38 = vld [vmem:[%s4886_s17 + $0x358] ss:$28 sps:$4 sm:$0xff]  }
  0x96   : > { %1659 = vmatmul.mubr.bf16.gmra.mrb[52].mxu1 %v4498_v39  ;;  %1756 = vmatmul.mubr.bf16.gmra.mrb[52].mxu0 %v4499_v40  ;;  %v4575_v39 = vld [vmem:[%s4886_s17 + $0x360] ss:$28 sps:$4 sm:$0xff]   ;;  %s5825_s17 = scalar_lea.hbm %s5879_s6, %s3641_s13 }
  0x97   : > { %1666 = vmatprep.mubr.bf16.mxu1 %v4500_v41  ;;  %1763 = vmatprep.mubr.bf16.mxu0 %v4502_v42 }
  0x9e   : > { %1667 = vmatmul.mubr.bf16.gmra.mrb[56].mxu1 %v4504_v43  ;;  %1764 = vmatmul.mubr.bf16.gmra.mrb[56].mxu0 %v4505_v44 }
  0x9f   : > { %1674 = vmatprep.mubr.bf16.mxu1 %v4506_v45  ;;  %1771 = vmatprep.mubr.bf16.mxu0 %v4508_v46 }
  0xa6   : > { %1675 = vmatmul.mubr.bf16.gmra.mrb[60].mxu1 %v4510_v47  ;;  %1772 = vmatmul.mubr.bf16.gmra.mrb[60].mxu0 %v4511_v48 }
  0xa7   : > { %1682 = vmatprep.mubr.bf16.mxu1 %v4512_v49  ;;  %1779 = vmatprep.mubr.bf16.mxu0 %v4514_v50 }
  0xae   : > { %1683 = vmatmul.mubr.bf16.gmra.mrb[64].mxu1 %v4516_v51  ;;  %1780 = vmatmul.mubr.bf16.gmra.mrb[64].mxu0 %v4517_v52 }
  0xaf   : > { %1690 = vmatprep.mubr.bf16.mxu1 %v4518_v53  ;;  %1787 = vmatprep.mubr.bf16.mxu0 %v4520_v54 }
  0xb6   : > { %1691 = vmatmul.mubr.bf16.gmra.mrb[68].mxu1 %v4522_v55  ;;  %1788 = vmatmul.mubr.bf16.gmra.mrb[68].mxu0 %v4523_v56 }
  0xb7   : > { %1698 = vmatprep.mubr.bf16.mxu1 %v4524_v57  ;;  %1795 = vmatprep.mubr.bf16.mxu0 %v4526_v58 }
  0xbe   : > { %1699 = vmatmul.mubr.bf16.gmra.mrb[72].mxu1 %v4528_v59  ;;  %1796 = vmatmul.mubr.bf16.gmra.mrb[72].mxu0 %v4529_v60 }
  0xbf   : > { %1706 = vmatprep.mubr.bf16.mxu1 %v4530_v61  ;;  %1803 = vmatprep.mubr.bf16.mxu0 %v4532_v62 }
  0xc6   : > { %1707 = vmatmul.mubr.bf16.gmra.mrb[76].mxu1 %v4534_v63  ;;  %1804 = vmatmul.mubr.bf16.gmra.mrb[76].mxu0 %v4535_v0 }
  0xc7   : > { %1811 = vmatprep.mubr.bf16.mxu0 %v4536_v1  ;;  %4160 = vmatprep.mubr.msk.bf16.mxu1 %vm1344_vm0, %v4538_v2 }
  0xce   : > { %1812 = vmatmul.mubr.bf16.gmra.mrb[80].mxu0 %v4539_v3  ;;  %4161 = vmatmul.mubr.msk.bf16.vlgmr.msra.gmra.mrb[80].mxu1 %vm1344_vm0, %v4540_v4 }
  0xcf   : > { %1819 = vmatprep.mubr.bf16.mxu0 %v4541_v5  ;;  %4164 = vmatprep.mubr.msk.bf16.mxu1 %vm1344_vm0, %v4543_v6 }
  0xd0   : > { %4301 = vmatpush3.bf16.msk.msra.mxu1 %vm4297_vm3, %v4296_v23 }
  0xd6   : > { %1820 = vmatmul.mubr.bf16.gmra.mrb[84].mxu0 %v4544_v7  ;;  %4165 = vmatmul.mubr.msk.bf16.gmra.mrb[84].mxu1 %vm1344_vm0, %v4545_v8 }
  0xd7   : > { %1827 = vmatprep.mubr.bf16.mxu0 %v4546_v9  ;;  %4168 = vmatprep.mubr.msk.bf16.mxu1 %vm1344_vm0, %v4548_v10 }
  0xde   : > { %1828 = vmatmul.mubr.bf16.gmra.mrb[88].mxu0 %v4549_v11  ;;  %4169 = vmatmul.mubr.msk.bf16.gmra.mrb[88].mxu1 %vm1344_vm0, %v4550_v12 }
  0xdf   : > { %1835 = vmatprep.mubr.bf16.mxu0 %v4551_v13  ;;  %4172 = vmatprep.mubr.msk.bf16.mxu1 %vm1344_vm0, %v4553_v14 }
  0xe6   : > { %1836 = vmatmul.mubr.bf16.gmra.mrb[92].mxu0 %v4554_v15  ;;  %4173 = vmatmul.mubr.msk.bf16.gmra.mrb[92].mxu1 %vm1344_vm0, %v4555_v16 }
  0xe7   : > { %1843 = vmatprep.mubr.bf16.mxu0 %v4556_v17  ;;  %4176 = vmatprep.mubr.msk.bf16.mxu1 %vm1344_vm0, %v4558_v18 }
  0xee   : > { %1844 = vmatmul.mubr.bf16.gmra.mrb[96].mxu0 %v4559_v21  ;;  %4177 = vmatmul.mubr.msk.bf16.gmra.mrb[96].mxu1 %vm1344_vm0, %v4560_v22  ;;  %v5162_v22 = vld [vmem:[%s5875_s2] ss:$0 sm:$0xff] }
  0xef   : > { %1851 = vmatprep.mubr.bf16.mxu0 %v4561_v24  ;;  %4180 = vmatprep.mubr.msk.bf16.mxu1 %vm1344_vm0, %v4563_v25 }
  0xf6   : > { %1852 = vmatmul.mubr.bf16.gmra.mrb[100].mxu0 %v4564_v26  ;;  %4181 = vmatmul.mubr.msk.bf16.gmra.mrb[100].mxu1 %vm1344_vm0, %v4565_v27 }
  0xf7   : > { %1859 = vmatprep.mubr.bf16.mxu0 %v4566_v28  ;;  %4184 = vmatprep.mubr.msk.bf16.mxu1 %vm1344_vm0, %v4568_v29 }
  0xfe   : > { %1860 = vmatmul.mubr.bf16.gmra.mrb[104].mxu0 %v4569_v30  ;;  %4185 = vmatmul.mubr.msk.bf16.gmra.mrb[104].mxu1 %vm1344_vm0, %v4570_v31 }
  0xff   : > { %1867 = vmatprep.mubr.bf16.mxu0 %v4571_v32  ;;  %4188 = vmatprep.mubr.msk.bf16.mxu1 %vm1344_vm0, %v4573_v33 }
 0x101   : > { %v3825_v34 = vpop.f32.mrb[0].mxu1  ;;  %v3753_v35 = vpop.f32.mrb[0].mxu0 }
 0x102   : > { %v3826_v36 = vpop.f32.mrb[1].mxu1  ;;  %v3754_v37 = vpop.f32.mrb[1].mxu0 }
 0x103   : > { %v5142_v40 = vadd.f32 %v3826_v36, %v3825_v34  ;;  %v3755_v41 = vadd.f32 %v3754_v37, %v3753_v35  ;;  %v3828_v42 = vpop.f32.mrb[2].mxu1  ;;  %v3756_v43 = vpop.f32.mrb[2].mxu0 }
 0x104   : > { %v3829_v44 = vpop.f32.mrb[3].mxu1  ;;  %v3757_v45 = vpop.f32.mrb[3].mxu0 }
 0x105   : > { %v5144_v46 = vadd.f32 %v3829_v44, %v3828_v42  ;;  %v3758_v47 = vadd.f32 %v3757_v45, %v3756_v43  ;;  %v1428_v25 = vadd.f32 %v3755_v41, %v5162_v22 }
 0x106   : > { %1868 = vmatmul.mubr.bf16.gmra.mrb[108].mxu0 %v4574_v38  ;;  %4189 = vmatmul.mubr.msk.bf16.gmra.mrb[108].mxu1 %vm1344_vm0, %v4575_v39 }
 0x107   : > { %v1431_v32 = vadd.f32 %v3758_v47, %v5162_v22 }
 0x109   : > { %v3831_v48 = vpop.f32.mrb[4].mxu1  ;;  %v3759_v49 = vpop.f32.mrb[4].mxu0 }
 0x10a   : > { %v3832_v50 = vpop.f32.mrb[5].mxu1  ;;  %v3760_v51 = vpop.f32.mrb[5].mxu0 }
 0x10b   : > { %v5147_v52 = vadd.f32 %v3832_v50, %v3831_v48  ;;  %v3761_v53 = vadd.f32 %v3760_v51, %v3759_v49  ;;  %v3834_v54 = vpop.f32.mrb[6].mxu1  ;;  %v3762_v55 = vpop.f32.mrb[6].mxu0 }
 0x10c   : > { %v3835_v56 = vpop.f32.mrb[7].mxu1  ;;  %v3763_v57 = vpop.f32.mrb[7].mxu0 }
 0x10d   : > { %v5149_v58 = vadd.f32 %v3835_v56, %v3834_v54  ;;  %v3764_v59 = vadd.f32 %v3763_v57, %v3762_v55  ;;  %v1436_v41 = vadd.f32 %v3761_v53, %v5162_v22 }
 0x10f   : > { %v1439_v47 = vadd.f32 %v3764_v59, %v5162_v22 }
 0x111   : > { %v3837_v60 = vpop.f32.mrb[8].mxu1  ;;  %v3765_v61 = vpop.f32.mrb[8].mxu0 }
 0x112   : > { %v3838_v62 = vpop.f32.mrb[9].mxu1  ;;  %v3766_v63 = vpop.f32.mrb[9].mxu0 }
 0x113   : > { %v5151_v0 = vadd.f32 %v3838_v62, %v3837_v60  ;;  %v3767_v1 = vadd.f32 %v3766_v63, %v3765_v61  ;;  %v3840_v2 = vpop.f32.mrb[10].mxu1  ;;  %v3768_v3 = vpop.f32.mrb[10].mxu0 }
 0x114   : > { %v3841_v4 = vpop.f32.mrb[11].mxu1  ;;  %v3769_v5 = vpop.f32.mrb[11].mxu0 }
 0x115   : > { %v5153_v6 = vadd.f32 %v3841_v4, %v3840_v2  ;;  %v3770_v7 = vadd.f32 %v3769_v5, %v3768_v3  ;;  %v1444_v53 = vadd.f32 %v3767_v1, %v5162_v22 }
 0x117   : > { %v1447_v59 = vadd.f32 %v3770_v7, %v5162_v22 }
 0x119   : > { %v3843_v8 = vpop.f32.mrb[12].mxu1  ;;  %v3771_v9 = vpop.f32.mrb[12].mxu0 }
 0x11a   : > { %v3844_v10 = vpop.f32.mrb[13].mxu1  ;;  %v3772_v11 = vpop.f32.mrb[13].mxu0 }
 0x11b   : > { %v5155_v12 = vadd.f32 %v3844_v10, %v3843_v8  ;;  %v3773_v13 = vadd.f32 %v3772_v11, %v3771_v9  ;;  %v3846_v14 = vpop.f32.mrb[14].mxu1  ;;  %v3774_v15 = vpop.f32.mrb[14].mxu0 }
 0x11c   : > { %v3847_v16 = vpop.f32.mrb[15].mxu1  ;;  %v3775_v17 = vpop.f32.mrb[15].mxu0 }
 0x11d   : > { %v5157_v18 = vadd.f32 %v3847_v16, %v3846_v14  ;;  %v3776_v19 = vadd.f32 %v3775_v17, %v3774_v15  ;;  %v1452_v1 = vadd.f32 %v3773_v13, %v5162_v22 }
 0x11f   : > { %v1455_v7 = vadd.f32 %v3776_v19, %v5162_v22 }
 0x121   : > { %v3865_v20 = vpop.f32.mrb[16].mxu1  ;;  %v3777_v21 = vpop.f32.mrb[16].mxu0 }
 0x122   : > { %v3866_v23 = vpop.f32.mrb[17].mxu1  ;;  %v3778_v24 = vpop.f32.mrb[17].mxu0 }
 0x123   : > { %v3867_v26 = vadd.f32 %v3866_v23, %v3865_v20  ;;  %v3779_v27 = vadd.f32 %v3778_v24, %v3777_v21  ;;  %v3868_v28 = vpop.f32.mrb[18].mxu1  ;;  %v3780_v29 = vpop.f32.mrb[18].mxu0 }
 0x124   : > { %v3869_v30 = vpop.f32.mrb[19].mxu1  ;;  %v3781_v31 = vpop.f32.mrb[19].mxu0 }
 0x125   : > { %v5166_v33 = vadd.f32 %v3867_v26, %v1428_v25  ;;  %v3870_v34 = vadd.f32 %v3869_v30, %v3868_v28  ;;  %v3782_v35 = vadd.f32 %v3781_v31, %v3780_v29  ;;  %v1460_v13 = vadd.f32 %v3779_v27, %v5162_v22 }
 0x127   : > { %v5168_v36 = vadd.f32 %v3870_v34, %v1431_v32  ;;  %v1463_v19 = vadd.f32 %v3782_v35, %v5162_v22 }
 0x129   : > { %v3871_v37 = vpop.f32.mrb[20].mxu1  ;;  %v3783_v38 = vpop.f32.mrb[20].mxu0 }
 0x12a   : > { %v3872_v39 = vpop.f32.mrb[21].mxu1  ;;  %v3784_v42 = vpop.f32.mrb[21].mxu0 }
 0x12b   : > { %v3873_v43 = vadd.f32 %v3872_v39, %v3871_v37  ;;  %v3785_v44 = vadd.f32 %v3784_v42, %v3783_v38  ;;  %v3874_v45 = vpop.f32.mrb[22].mxu1  ;;  %v3786_v48 = vpop.f32.mrb[22].mxu0 }
 0x12c   : > { %v3875_v49 = vpop.f32.mrb[23].mxu1  ;;  %v3787_v50 = vpop.f32.mrb[23].mxu0 }
 0x12d   : > { %v5172_v51 = vadd.f32 %v3873_v43, %v1436_v41  ;;  %v3876_v54 = vadd.f32 %v3875_v49, %v3874_v45  ;;  %v3788_v55 = vadd.f32 %v3787_v50, %v3786_v48  ;;  %v1468_v27 = vadd.f32 %v3785_v44, %v5162_v22 }
 0x12f   : > { %v5174_v56 = vadd.f32 %v3876_v54, %v1439_v47  ;;  %v1471_v35 = vadd.f32 %v3788_v55, %v5162_v22 }
 0x131   : > { %v3877_v57 = vpop.f32.mrb[24].mxu1  ;;  %v3789_v60 = vpop.f32.mrb[24].mxu0 }
 0x132   : > { %v3878_v61 = vpop.f32.mrb[25].mxu1  ;;  %v3790_v62 = vpop.f32.mrb[25].mxu0 }
 0x133   : > { %v3879_v63 = vadd.f32 %v3878_v61, %v3877_v57  ;;  %v3791_v2 = vadd.f32 %v3790_v62, %v3789_v60  ;;  %v3880_v3 = vpop.f32.mrb[26].mxu1  ;;  %v3792_v4 = vpop.f32.mrb[26].mxu0 }
 0x134   : > { %v3881_v5 = vpop.f32.mrb[27].mxu1  ;;  %v3793_v8 = vpop.f32.mrb[27].mxu0 }
 0x135   : > { %v5178_v9 = vadd.f32 %v3879_v63, %v1444_v53  ;;  %v3882_v10 = vadd.f32 %v3881_v5, %v3880_v3  ;;  %v3794_v11 = vadd.f32 %v3793_v8, %v3792_v4  ;;  %v1476_v44 = vadd.f32 %v3791_v2, %v5162_v22 }
 0x137   : > { %v5180_v14 = vadd.f32 %v3882_v10, %v1447_v59  ;;  %v1479_v55 = vadd.f32 %v3794_v11, %v5162_v22 }
 0x139   : > { %v3883_v15 = vpop.f32.mrb[28].mxu1  ;;  %v3795_v16 = vpop.f32.mrb[28].mxu0 }
 0x13a   : > { %v3884_v17 = vpop.f32.mrb[29].mxu1  ;;  %v3796_v20 = vpop.f32.mrb[29].mxu0 }
 0x13b   : > { %v3885_v21 = vadd.f32 %v3884_v17, %v3883_v15  ;;  %v3797_v23 = vadd.f32 %v3796_v20, %v3795_v16  ;;  %v3886_v24 = vpop.f32.mrb[30].mxu1  ;;  %v3798_v25 = vpop.f32.mrb[30].mxu0 }
 0x13c   : > { %v3887_v26 = vpop.f32.mrb[31].mxu1  ;;  %v3799_v28 = vpop.f32.mrb[31].mxu0 }
 0x13d   : > { %v5184_v29 = vadd.f32 %v3885_v21, %v1452_v1  ;;  %v3888_v30 = vadd.f32 %v3887_v26, %v3886_v24  ;;  %v3800_v31 = vadd.f32 %v3799_v28, %v3798_v25 }
 0x13f   : > { %v5186_v32 = vadd.f32 %v3888_v30, %v1455_v7 }
 0x141   : > { %v3889_v34 = vpop.f32.mrb[32].mxu1  ;;  %v3801_v37 = vpop.f32.mrb[32].mxu0 }
 0x142   : > { %v3890_v38 = vpop.f32.mrb[33].mxu1  ;;  %v3802_v39 = vpop.f32.mrb[33].mxu0 }
 0x143   : > { %v3891_v42 = vadd.f32 %v3890_v38, %v3889_v34  ;;  %v3803_v41 = vadd.f32 %v3802_v39, %v3801_v37  ;;  %v3892_v43 = vpop.f32.mrb[34].mxu1  ;;  %v3804_v45 = vpop.f32.mrb[34].mxu0 }
 0x144   : > { %v3893_v48 = vpop.f32.mrb[35].mxu1  ;;  %v3805_v49 = vpop.f32.mrb[35].mxu0 }
 0x145   : > { %v5190_v50 = vadd.f32 %v3891_v42, %v1460_v13  ;;  %v3894_v47 = vadd.f32 %v3893_v48, %v3892_v43  ;;  %v3806_v54 = vadd.f32 %v3805_v49, %v3804_v45  ;;  %v1484_v48 = vadd.f32 %v3797_v23, %v5162_v22 }
 0x147   : > { %v5192_v57 = vadd.f32 %v3894_v47, %v1463_v19 }
 0x149   : > { %v3895_v60 = vpop.f32.mrb[36].mxu1  ;;  %v3807_v61 = vpop.f32.mrb[36].mxu0 }
 0x14a   : > { %v3896_v62 = vpop.f32.mrb[37].mxu1  ;;  %v3808_v53 = vpop.f32.mrb[37].mxu0 }
 0x14b   : > { %v3897_v63 = vadd.f32 %v3896_v62, %v3895_v60  ;;  %v5195_v3 = vadd.f32 %v3808_v53, %v3807_v61  ;;  %v3898_v4 = vpop.f32.mrb[38].mxu1  ;;  %v3810_v5 = vpop.f32.mrb[38].mxu0  ;;  %v1487_v62 = vadd.f32 %v3800_v31, %v5162_v22 }
 0x14c   : > { %v3899_v8 = vpop.f32.mrb[39].mxu1  ;;  %v3811_v59 = vpop.f32.mrb[39].mxu0 }
 0x14d   : > { %v5198_v10 = vadd.f32 %v3897_v63, %v1468_v27  ;;  %v3900_v15 = vadd.f32 %v3899_v8, %v3898_v4  ;;  %v3812_v16 = vadd.f32 %v3811_v59, %v3810_v5 }
 0x14f   : > { %v5200_v17 = vadd.f32 %v3900_v15, %v1471_v35  ;;  %v1492_v35 = vadd.f32 %v3803_v41, %v5162_v22 }
 0x151   : > { %v3901_v20 = vpop.f32.mrb[40].mxu1  ;;  %v3813_v1 = vpop.f32.mrb[40].mxu0 }
 0x152   : > { %v3902_v21 = vpop.f32.mrb[41].mxu1  ;;  %v3814_v24 = vpop.f32.mrb[41].mxu0 }
 0x153   : > { %v3903_v25 = vadd.f32 %v3902_v21, %v3901_v20  ;;  %v5203_v26 = vadd.f32 %v3814_v24, %v3813_v1  ;;  %v3904_v28 = vpop.f32.mrb[42].mxu1  ;;  %v3816_v7 = vpop.f32.mrb[42].mxu0  ;;  %v1495_v24 = vadd.f32 %v3806_v54, %v5162_v22  ;;  %v1500_v54 = vadd.f32 %v5195_v3, %v5162_v22 }
 0x154   : > { %v3905_v30 = vpop.f32.mrb[43].mxu1  ;;  %v3817_v34 = vpop.f32.mrb[43].mxu0 }
 0x155   : > { %v5206_v37 = vadd.f32 %v3903_v25, %v1476_v44  ;;  %v3906_v38 = vadd.f32 %v3905_v30, %v3904_v28  ;;  %v5208_v39 = vadd.f32 %v3817_v34, %v3816_v7 }
 0x157   : > { %v5210_v13 = vadd.f32 %v3906_v38, %v1479_v55 }
 0x159   : > { %v3907_v42 = vpop.f32.mrb[44].mxu1  ;;  %v3819_v43 = vpop.f32.mrb[44].mxu0 }
 0x15a   : > { %v3908_v45 = vpop.f32.mrb[45].mxu1  ;;  %v3820_v2 = vpop.f32.mrb[45].mxu0 }
 0x15b   : > { %v3909_v49 = vadd.f32 %v3908_v45, %v3907_v42  ;;  %v5213_v19 = vadd.f32 %v3820_v2, %v3819_v43  ;;  %v3910_v47 = vpop.f32.mrb[46].mxu1  ;;  %v3822_v60 = vpop.f32.mrb[46].mxu0 }
 0x15c   : > { %v3911_v61 = vpop.f32.mrb[47].mxu1  ;;  %v3823_v11 = vpop.f32.mrb[47].mxu0 }
 0x15d   : > { %v5216_v53 = vadd.f32 %v3909_v49, %v1484_v48  ;;  %v3912_v27 = vadd.f32 %v3911_v61, %v3910_v47  ;;  %v5218_v63 = vadd.f32 %v3823_v11, %v3822_v60  ;;  %v1503_v47 = vadd.f32 %v3812_v16, %v5162_v22 }
 0x15e   : > { %v1508_v16 = vadd.f32 %v5203_v26, %v5162_v22 }
 0x15f   : > { %v5220_v4 = vadd.f32 %v3912_v27, %v1487_v62 }
 0x161   : > { %v3913_v5 = vpop.f32.mrb[48].mxu1  ;;  %v3977_v8 = vpop.f32.mrb[48].mxu0 }
 0x162   : > { %v3914_v59 = vpop.f32.mrb[49].mxu1  ;;  %v3978_v23 = vpop.f32.mrb[49].mxu0 }
 0x163   : > { %v3915_v15 = vadd.f32 %v3914_v59, %v3913_v5  ;;  %v3979_v20 = vadd.f32 %v3978_v23, %v3977_v8  ;;  %v3916_v1 = vpop.f32.mrb[50].mxu1  ;;  %v3980_v21 = vpop.f32.mrb[50].mxu0 }
 0x164   : > { %v3917_v31 = vpop.f32.mrb[51].mxu1  ;;  %v3981_v44 = vpop.f32.mrb[51].mxu0 }
 0x165   : > { %v5224_v25 = vadd.f32 %v3915_v15, %v1492_v35  ;;  %v3918_v28 = vadd.f32 %v3917_v31, %v3916_v1  ;;  %v3982_v7 = vadd.f32 %v3981_v44, %v3980_v21  ;;  %v5227_v30 = vadd.f32 %v3979_v20, %v5166_v33 }
 0x167   : > { %v5229_v34 = vadd.f32 %v3918_v28, %v1495_v24  ;;  %v5232_v55 = vadd.f32 %v3982_v7, %v5168_v36 }
 0x169   : > { %v3919_v41 = vpop.f32.mrb[52].mxu1  ;;  %v3983_v38 = vpop.f32.mrb[52].mxu0 }
 0x16a   : > { %v3920_v42 = vpop.f32.mrb[53].mxu1  ;;  %v3984_v43 = vpop.f32.mrb[53].mxu0 }
 0x16b   : > { %v3921_v45 = vadd.f32 %v3920_v42, %v3919_v41  ;;  %v3985_v2 = vadd.f32 %v3984_v43, %v3983_v38  ;;  %v3922_v48 = vpop.f32.mrb[54].mxu1  ;;  %v3986_v49 = vpop.f32.mrb[54].mxu0 }
 0x16c   : > { %v3923_v33 = vpop.f32.mrb[55].mxu1  ;;  %v3987_v60 = vpop.f32.mrb[55].mxu0 }
 0x16d   : > { %v5237_v61 = vadd.f32 %v3921_v45, %v1500_v54  ;;  %v3924_v11 = vadd.f32 %v3923_v33, %v3922_v48  ;;  %v3988_v36 = vadd.f32 %v3987_v60, %v3986_v49  ;;  %v5240_v62 = vadd.f32 %v3985_v2, %v5172_v51 }
 0x16e   : > { %v1511_v51 = vadd.f32 %v5208_v39, %v5162_v22  ;;  %v1516_v39 = vadd.f32 %v5213_v19, %v5162_v22 }
 0x16f   : > { %v5242_v27 = vadd.f32 %v3924_v11, %v1503_v47  ;;  %v5245_v5 = vadd.f32 %v3988_v36, %v5174_v56 }
 0x171   : > { %v3925_v3 = vpop.f32.mrb[56].mxu1  ;;  %v3989_v8 = vpop.f32.mrb[56].mxu0 }
 0x172   : > { %v3926_v59 = vpop.f32.mrb[57].mxu1  ;;  %v3990_v23 = vpop.f32.mrb[57].mxu0 }
 0x173   : > { %v3927_v35 = vadd.f32 %v3926_v59, %v3925_v3  ;;  %v3991_v15 = vadd.f32 %v3990_v23, %v3989_v8  ;;  %v3928_v20 = vpop.f32.mrb[58].mxu1  ;;  %v3992_v1 = vpop.f32.mrb[58].mxu0 }
 0x174   : > { %v3929_v21 = vpop.f32.mrb[59].mxu1  ;;  %v3993_v24 = vpop.f32.mrb[59].mxu0 }
 0x175   : > { %v5251_v31 = vadd.f32 %v3927_v35, %v1508_v16  ;;  %v3930_v56 = vadd.f32 %v3929_v21, %v3928_v20  ;;  %v3994_v44 = vadd.f32 %v3993_v24, %v3992_v1  ;;  %v5254_v28 = vadd.f32 %v3991_v15, %v5178_v9 }
 0x176   : > { %v1519_v9 = vadd.f32 %v5218_v63, %v5162_v22  ;;  %v1524_v63 = vadd.f32 %v5142_v40, %v5162_v22 }
 0x177   : > { %v5256_v7 = vadd.f32 %v3930_v56, %v1511_v51  ;;  %v5259_v26 = vadd.f32 %v3994_v44, %v5180_v14 }
 0x179   : > { %v3931_v41 = vpop.f32.mrb[60].mxu1  ;;  %v3995_v38 = vpop.f32.mrb[60].mxu0 }
 0x17a   : > { %v3932_v42 = vpop.f32.mrb[61].mxu1  ;;  %v3996_v43 = vpop.f32.mrb[61].mxu0 }
 0x17b   : > { %v3933_v54 = vadd.f32 %v3932_v42, %v3931_v41  ;;  %v3997_v45 = vadd.f32 %v3996_v43, %v3995_v38  ;;  %v3934_v2 = vpop.f32.mrb[62].mxu1  ;;  %v3998_v48 = vpop.f32.mrb[62].mxu0 }
 0x17c   : > { %v3935_v49 = vpop.f32.mrb[63].mxu1  ;;  %v3999_v47 = vpop.f32.mrb[63].mxu0 }
 0x17d   : > { %v5265_v33 = vadd.f32 %v3933_v54, %v1516_v39  ;;  %v3936_v14 = vadd.f32 %v3935_v49, %v3934_v2  ;;  %v4000_v60 = vadd.f32 %v3999_v47, %v3998_v48  ;;  %v5268_v11 = vadd.f32 %v3997_v45, %v5184_v29 }
 0x17e   : > { %v1527_v29 = vadd.f32 %v5144_v46, %v5162_v22  ;;  %v1532_v46 = vadd.f32 %v5147_v52, %v5162_v22 }
 0x17f   : > { %v5270_v36 = vadd.f32 %v3936_v14, %v1519_v9  ;;  %v5273_v19 = vadd.f32 %v4000_v60, %v5186_v32 }
 0x181   : > { %v3937_v3 = vpop.f32.mrb[64].mxu1  ;;  %v4001_v8 = vpop.f32.mrb[64].mxu0 }
 0x182   : > { %v3938_v59 = vpop.f32.mrb[65].mxu1  ;;  %v4002_v23 = vpop.f32.mrb[65].mxu0 }
 0x183   : > { %v3939_v16 = vadd.f32 %v3938_v59, %v3937_v3  ;;  %v4003_v35 = vadd.f32 %v4002_v23, %v4001_v8  ;;  %v3940_v15 = vpop.f32.mrb[66].mxu1  ;;  %v4004_v20 = vpop.f32.mrb[66].mxu0 }
 0x184   : > { %v3941_v1 = vpop.f32.mrb[67].mxu1  ;;  %v4005_v51 = vpop.f32.mrb[67].mxu0 }
 0x185   : > { %v5279_v21 = vadd.f32 %v3939_v16, %v1524_v63  ;;  %v3942_v32 = vadd.f32 %v3941_v1, %v3940_v15  ;;  %v4006_v24 = vadd.f32 %v4005_v51, %v4004_v20  ;;  %v5282_v56 = vadd.f32 %v4003_v35, %v5190_v50 }
 0x186   : > { %v1535_v50 = vadd.f32 %v5149_v58, %v5162_v22  ;;  %v1540_v58 = vadd.f32 %v5151_v0, %v5162_v22 }
 0x187   : > { %v5284_v44 = vadd.f32 %v3942_v32, %v1527_v29  ;;  %v5287_v40 = vadd.f32 %v4006_v24, %v5192_v57 }
 0x189   : > { %v3943_v41 = vpop.f32.mrb[68].mxu1  ;;  %v4007_v38 = vpop.f32.mrb[68].mxu0 }
 0x18a   : > { %v3944_v42 = vpop.f32.mrb[69].mxu1  ;;  %v4008_v43 = vpop.f32.mrb[69].mxu0 }
 0x18b   : > { %v3945_v39 = vadd.f32 %v3944_v42, %v3943_v41  ;;  %v4009_v54 = vadd.f32 %v4008_v43, %v4007_v38  ;;  %v3946_v45 = vpop.f32.mrb[70].mxu1  ;;  %v4010_v2 = vpop.f32.mrb[70].mxu0 }
 0x18c   : > { %v3947_v48 = vpop.f32.mrb[71].mxu1  ;;  %v4011_v9 = vpop.f32.mrb[71].mxu0 }
 0x18d   : > { %v5293_v49 = vadd.f32 %v3945_v39, %v1532_v46  ;;  %v3948_v57 = vadd.f32 %v3947_v48, %v3946_v45  ;;  %v4012_v47 = vadd.f32 %v4011_v9, %v4010_v2  ;;  %v5296_v14 = vadd.f32 %v4009_v54, %v5198_v10 }
 0x18e   : > { %v1543_v10 = vadd.f32 %v5153_v6, %v5162_v22  ;;  %v1548_v6 = vadd.f32 %v5155_v12, %v5162_v22 }
 0x18f   : > { %v5298_v60 = vadd.f32 %v3948_v57, %v1535_v50  ;;  %v5301_v52 = vadd.f32 %v4012_v47, %v5200_v17 }
 0x191   : > { %v3949_v3 = vpop.f32.mrb[72].mxu1  ;;  %v4013_v8 = vpop.f32.mrb[72].mxu0 }
 0x192   : > { %v3950_v59 = vpop.f32.mrb[73].mxu1  ;;  %v4014_v23 = vpop.f32.mrb[73].mxu0 }
 0x193   : > { %v3951_v63 = vadd.f32 %v3950_v59, %v3949_v3  ;;  %v4015_v16 = vadd.f32 %v4014_v23, %v4013_v8  ;;  %v3952_v35 = vpop.f32.mrb[74].mxu1  ;;  %v4016_v15 = vpop.f32.mrb[74].mxu0 }
 0x194   : > { %v3953_v20 = vpop.f32.mrb[75].mxu1  ;;  %v4017_v29 = vpop.f32.mrb[75].mxu0 }
 0x195   : > { %v5307_v1 = vadd.f32 %v3951_v63, %v1540_v58  ;;  %v3954_v17 = vadd.f32 %v3953_v20, %v3952_v35  ;;  %v4018_v51 = vadd.f32 %v4017_v29, %v4016_v15  ;;  %v5310_v32 = vadd.f32 %v4015_v16, %v5206_v37 }
 0x196   : > { %v1551_v37 = vadd.f32 %v5157_v18, %v5162_v22 }
 0x197   : > { %v5312_v24 = vadd.f32 %v3954_v17, %v1543_v10  ;;  %v5315_v0 = vadd.f32 %v4018_v51, %v5210_v13 }
 0x199   : > { %v3955_v41 = vpop.f32.mrb[76].mxu1  ;;  %v4019_v38 = vpop.f32.mrb[76].mxu0 }
 0x19a   : > { %v3956_v42 = vpop.f32.mrb[77].mxu1  ;;  %v4020_v43 = vpop.f32.mrb[77].mxu0 }
 0x19b   : > { %v3957_v46 = vadd.f32 %v3956_v42, %v3955_v41  ;;  %v4021_v39 = vadd.f32 %v4020_v43, %v4019_v38  ;;  %v3958_v54 = vpop.f32.mrb[78].mxu1  ;;  %v4022_v45 = vpop.f32.mrb[78].mxu0 }
 0x19c   : > { %v3959_v2 = vpop.f32.mrb[79].mxu1  ;;  %v4023_v50 = vpop.f32.mrb[79].mxu0 }
 0x19d   : > { %v5321_v48 = vadd.f32 %v3957_v46, %v1548_v6  ;;  %v3960_v13 = vadd.f32 %v3959_v2, %v3958_v54  ;;  %v4024_v9 = vadd.f32 %v4023_v50, %v4022_v45  ;;  %v5324_v57 = vadd.f32 %v4021_v39, %v5216_v53 }
 0x19f   : > { %v5326_v47 = vadd.f32 %v3960_v13, %v1551_v37  ;;  %v5329_v12 = vadd.f32 %v4024_v9, %v5220_v4 }
 0x1a1   : > { %v4025_v3 = vpop.f32.mrb[80].mxu0  ;;  %v4162_v8 = vpop.f32.mrb[80].mxu1 }
 0x1a2   : > { %v1919_v59 = vadd.f32 %v4162_v8, %v5240_v62  ;;  %v4026_v23 = vpop.f32.mrb[81].mxu0  ;;  %v1910_v18 = vpop.f32.mrb[81].mxu1 }
 0x1a3   : > { %v4027_v22 = vadd.f32 %v4026_v23, %v4025_v3  ;;  %v1911_v58 = vadd.f32 %v1910_v18, %v5227_v30  ;;  %v4028_v63 = vpop.f32.mrb[82].mxu0  ;;  %v4163_v16 = vpop.f32.mrb[82].mxu1 }
 0x1a4   : > { %v1922_v35 = vadd.f32 %v4163_v16, %v5245_v5  ;;  %v4029_v53 = vpop.f32.mrb[83].mxu0  ;;  %v1913_v15 = vpop.f32.mrb[83].mxu1  ;;  %v2039_v30 = vmax.f32 %v1919_v59, 0.0 }
 0x1a5   : > { %v2037_v10 = vmax.f32 %v1911_v58, 0.0  ;;  %v4030_v20 = vadd.f32 %v4029_v53, %v4028_v63  ;;  %v1914_v4 = vadd.f32 %v1913_v15, %v5232_v55  ;;  %v5336_v29 = vadd.f32 %v4027_v22, %v5224_v25 }
 0x1a6   : > { %v2040_v55 = vmax.f32 %v1922_v35, 0.0 }
 0x1a7   : > { %v2038_v62 = vmax.f32 %v1914_v4, 0.0  ;;  %4196 = vmatprep.mubr.msk.f32.mxu1 %vm2078_vm4, %v2037_v10  ;;  %v5340_v17 = vadd.f32 %v4030_v20, %v5229_v34 }
 0x1a9   : > { %v4031_v51 = vpop.f32.mrb[84].mxu0  ;;  %v4166_v41 = vpop.f32.mrb[84].mxu1  ;;  %4197 = vmatmul.mubr.msk.f32.vlgmr.msra.gmra.mrb[112].mxu1 %vm2078_vm4, %v2038_v62 }
 0x1aa   : > { %v1935_v5 = vadd.f32 %v4166_v41, %v5268_v11  ;;  %v4032_v38 = vpop.f32.mrb[85].mxu0  ;;  %v1926_v42 = vpop.f32.mrb[85].mxu1  ;;  %4199 = vmatprep.mubr.msk.f32.mxu1 %vm2078_vm4, %v2039_v30 }
 0x1ab   : > { %v4033_v25 = vadd.f32 %v4032_v38, %v4031_v51  ;;  %v1927_v43 = vadd.f32 %v1926_v42, %v5254_v28  ;;  %v4034_v6 = vpop.f32.mrb[86].mxu0  ;;  %v4167_v46 = vpop.f32.mrb[86].mxu1 }
 0x1ac   : > { %v1938_v34 = vadd.f32 %v4167_v46, %v5273_v19  ;;  %v4035_v39 = vpop.f32.mrb[87].mxu0  ;;  %v1929_v54 = vpop.f32.mrb[87].mxu1  ;;  %v2043_v28 = vmax.f32 %v1935_v5, 0.0 }
 0x1ad   : > { %v2041_v45 = vmax.f32 %v1927_v43, 0.0  ;;  %v4036_v37 = vadd.f32 %v4035_v39, %v4034_v6  ;;  %v1930_v2 = vadd.f32 %v1929_v54, %v5259_v26  ;;  %4200 = vmatmul.mubr.msk.f32.gmra.mrb[114].mxu1 %vm2078_vm4, %v2040_v55  ;;  %v1822_v11 = vadd.f32 %v4033_v25, %v5237_v61 }
 0x1ae   : > { %v2044_v26 = vmax.f32 %v1938_v34, 0.0 }
 0x1af   : > { %v2042_v50 = vmax.f32 %v1930_v2, 0.0  ;;  %4202 = vmatprep.mubr.msk.f32.mxu1 %vm2078_vm4, %v2041_v45  ;;  %v1825_v13 = vadd.f32 %v4036_v37, %v5242_v27 }
 0x1b1   : > { %v4037_v9 = vpop.f32.mrb[88].mxu0  ;;  %v4170_v3 = vpop.f32.mrb[88].mxu1  ;;  %4203 = vmatmul.mubr.msk.f32.gmra.mrb[116].mxu1 %vm2078_vm4, %v2042_v50 }
 0x1b2   : > { %v1951_v19 = vadd.f32 %v4170_v3, %v5296_v14  ;;  %v4038_v8 = vpop.f32.mrb[89].mxu0  ;;  %v1942_v59 = vpop.f32.mrb[89].mxu1  ;;  %4205 = vmatprep.mubr.msk.f32.mxu1 %vm2078_vm4, %v2043_v28 }
 0x1b3   : > { %v4039_v23 = vadd.f32 %v4038_v8, %v4037_v9  ;;  %v1943_v61 = vadd.f32 %v1942_v59, %v5282_v56  ;;  %v4040_v18 = vpop.f32.mrb[90].mxu0  ;;  %v4171_v22 = vpop.f32.mrb[90].mxu1 }
 0x1b4   : > { %v1954_v58 = vadd.f32 %v4171_v22, %v5301_v52  ;;  %v4041_v27 = vpop.f32.mrb[91].mxu0  ;;  %v1945_v63 = vpop.f32.mrb[91].mxu1  ;;  %v2047_v56 = vmax.f32 %v1951_v19, 0.0 }
 0x1b5   : > { %v2045_v16 = vmax.f32 %v1943_v61, 0.0  ;;  %v4042_v35 = vadd.f32 %v4041_v27, %v4040_v18  ;;  %v1946_v53 = vadd.f32 %v1945_v63, %v5287_v40  ;;  %4206 = vmatmul.mubr.msk.f32.gmra.mrb[118].mxu1 %vm2078_vm4, %v2044_v26  ;;  %v1830_v14 = vadd.f32 %v4039_v23, %v5251_v31 }
 0x1b6   : > { %v2048_v40 = vmax.f32 %v1954_v58, 0.0 }
 0x1b7   : > { %v2046_v15 = vmax.f32 %v1946_v53, 0.0  ;;  %4208 = vmatprep.mubr.msk.f32.mxu1 %vm2078_vm4, %v2045_v16  ;;  %v5362_v10 = vadd.f32 %v4042_v35, %v5256_v7 }
 0x1b9   : > { %v4043_v20 = vpop.f32.mrb[92].mxu0  ;;  %v4174_v4 = vpop.f32.mrb[92].mxu1  ;;  %4209 = vmatmul.mubr.msk.f32.gmra.mrb[120].mxu1 %vm2078_vm4, %v2046_v15 }
 0x1ba   : > { %v1967_v52 = vadd.f32 %v4174_v4, %v5324_v57  ;;  %v4044_v62 = vpop.f32.mrb[93].mxu0  ;;  %v1958_v30 = vpop.f32.mrb[93].mxu1  ;;  %4211 = vmatprep.mubr.msk.f32.mxu1 %vm2078_vm4, %v2047_v56 }
 0x1bb   : > { %v4045_v51 = vadd.f32 %v4044_v62, %v4043_v20  ;;  %v1959_v31 = vadd.f32 %v1958_v30, %v5310_v32  ;;  %v4046_v41 = vpop.f32.mrb[94].mxu0  ;;  %v4175_v5 = vpop.f32.mrb[94].mxu1 }
 0x1bc   : > { %v1970_v7 = vadd.f32 %v4175_v5, %v5329_v12  ;;  %v4047_v38 = vpop.f32.mrb[95].mxu0  ;;  %v1961_v42 = vpop.f32.mrb[95].mxu1  ;;  %v2051_v32 = vmax.f32 %v1967_v52, 0.0 }
 0x1bd   : > { %v2049_v55 = vmax.f32 %v1959_v31, 0.0  ;;  %v4048_v25 = vadd.f32 %v4047_v38, %v4046_v41  ;;  %v1962_v43 = vadd.f32 %v1961_v42, %v5315_v0  ;;  %4212 = vmatmul.mubr.msk.f32.gmra.mrb[122].mxu1 %vm2078_vm4, %v2048_v40  ;;  %v1838_v57 = vadd.f32 %v4045_v51, %v5265_v33 }
 0x1be   : > { %v2052_v0 = vmax.f32 %v1970_v7, 0.0 }
 0x1bf   : > { %v2050_v6 = vmax.f32 %v1962_v43, 0.0  ;;  %4214 = vmatprep.mubr.msk.f32.mxu1 %vm2078_vm4, %v2049_v55  ;;  %v1841_v46 = vadd.f32 %v4048_v25, %v5270_v36 }
 0x1c1   : > { %v4049_v34 = vpop.f32.mrb[96].mxu0  ;;  %v4178_v39 = vpop.f32.mrb[96].mxu1  ;;  %4215 = vmatmul.mubr.msk.f32.gmra.mrb[124].mxu1 %vm2078_vm4, %v2050_v6 }
 0x1c2   : > { %v1983_v12 = vadd.f32 %v4178_v39, %v1822_v11  ;;  %v4050_v54 = vpop.f32.mrb[97].mxu0  ;;  %v1974_v45 = vpop.f32.mrb[97].mxu1  ;;  %4217 = vmatprep.mubr.msk.f32.mxu1 %vm2078_vm4, %v2051_v32 }
 0x1c3   : > { %v4051_v37 = vadd.f32 %v4050_v54, %v4049_v34  ;;  %v1975_v2 = vadd.f32 %v1974_v45, %v5336_v29  ;;  %v4052_v33 = vpop.f32.mrb[98].mxu0  ;;  %v4179_v50 = vpop.f32.mrb[98].mxu1 }
 0x1c4   : > { %v1986_v28 = vadd.f32 %v4179_v50, %v1825_v13  ;;  %v4053_v9 = vpop.f32.mrb[99].mxu0  ;;  %v1977_v3 = vpop.f32.mrb[99].mxu1  ;;  %v2055_v23 = vmax.f32 %v1983_v12, 0.0 }
 0x1c5   : > { %v2053_v36 = vmax.f32 %v1975_v2, 0.0  ;;  %v4054_v19 = vadd.f32 %v4053_v9, %v4052_v33  ;;  %v1978_v8 = vadd.f32 %v1977_v3, %v5340_v17  ;;  %4218 = vmatmul.mubr.msk.f32.gmra.mrb[126].mxu1 %vm2078_vm4, %v2052_v0  ;;  %v1846_v11 = vadd.f32 %v4051_v37, %v5279_v21 }
 0x1c6   : > { %v2056_v17 = vmax.f32 %v1986_v28, 0.0 }
 0x1c7   : > { %v2054_v59 = vmax.f32 %v1978_v8, 0.0  ;;  %4220 = vmatprep.mubr.msk.f32.mxu1 %vm2078_vm4, %v2053_v36  ;;  %v1849_v26 = vadd.f32 %v4054_v19, %v5284_v44 }
 0x1c9   : > { %v4055_v29 = vpop.f32.mrb[100].mxu0  ;;  %v4182_v61 = vpop.f32.mrb[100].mxu1  ;;  %4221 = vmatmul.mubr.msk.f32.gmra.mrb[128].mxu1 %vm2078_vm4, %v2054_v59 }
 0x1ca   : > { %v1999_v13 = vadd.f32 %v4182_v61, %v1838_v57  ;;  %v4056_v18 = vpop.f32.mrb[101].mxu0  ;;  %v1990_v22 = vpop.f32.mrb[101].mxu1  ;;  %4223 = vmatprep.mubr.msk.f32.mxu1 %vm2078_vm4, %v2055_v23 }
 0x1cb   : > { %v4057_v58 = vadd.f32 %v4056_v18, %v4055_v29  ;;  %v1991_v27 = vadd.f32 %v1990_v22, %v1830_v14  ;;  %v4058_v63 = vpop.f32.mrb[102].mxu0  ;;  %v4183_v21 = vpop.f32.mrb[102].mxu1 }
 0x1cc   : > { %v2002_v16 = vadd.f32 %v4183_v21, %v1841_v46  ;;  %v4059_v35 = vpop.f32.mrb[103].mxu0  ;;  %v1993_v53 = vpop.f32.mrb[103].mxu1  ;;  %v2059_v62 = vmax.f32 %v1999_v13, 0.0 }
 0x1cd   : > { %v2057_v15 = vmax.f32 %v1991_v27, 0.0  ;;  %v4060_v44 = vadd.f32 %v4059_v35, %v4058_v63  ;;  %v1994_v56 = vadd.f32 %v1993_v53, %v5362_v10  ;;  %4224 = vmatmul.mubr.msk.f32.gmra.mrb[130].mxu1 %vm2078_vm4, %v2056_v17  ;;  %v1854_v20 = vadd.f32 %v4057_v58, %v5293_v49 }
 0x1ce   : > { %v2060_v10 = vmax.f32 %v2002_v16, 0.0 }
 0x1cf   : > { %v2058_v4 = vmax.f32 %v1994_v56, 0.0  ;;  %4226 = vmatprep.mubr.msk.f32.mxu1 %vm2078_vm4, %v2057_v15  ;;  %v1857_v52 = vadd.f32 %v4060_v44, %v5298_v60 }
 0x1d1   : > { %v4061_v14 = vpop.f32.mrb[104].mxu0  ;;  %v4186_v30 = vpop.f32.mrb[104].mxu1  ;;  %4227 = vmatmul.mubr.msk.f32.gmra.mrb[132].mxu1 %vm2078_vm4, %v2058_v4 }
 0x1d2   : > { %v2015_v40 = vadd.f32 %v4186_v30, %v1854_v20  ;;  %v4062_v51 = vpop.f32.mrb[105].mxu0  ;;  %v2006_v31 = vpop.f32.mrb[105].mxu1  ;;  %4229 = vmatprep.mubr.msk.f32.mxu1 %vm2078_vm4, %v2059_v62 }
 0x1d3   : > { %v4063_v41 = vadd.f32 %v4062_v51, %v4061_v14  ;;  %v2007_v5 = vadd.f32 %v2006_v31, %v1846_v11  ;;  %v4064_v7 = vpop.f32.mrb[106].mxu0  ;;  %v4187_v49 = vpop.f32.mrb[106].mxu1 }
 0x1d4   : > { %v2018_v38 = vadd.f32 %v4187_v49, %v1857_v52  ;;  %v4065_v42 = vpop.f32.mrb[107].mxu0  ;;  %v2009_v55 = vpop.f32.mrb[107].mxu1  ;;  %v2063_v32 = vmax.f32 %v2015_v40, 0.0 }
 0x1d5   : > { %v2061_v25 = vmax.f32 %v2007_v5, 0.0  ;;  %v4066_v60 = vadd.f32 %v4065_v42, %v4064_v7  ;;  %v2010_v43 = vadd.f32 %v2009_v55, %v1849_v26  ;;  %4230 = vmatmul.mubr.msk.f32.gmra.mrb[134].mxu1 %vm2078_vm4, %v2060_v10  ;;  %v1862_v57 = vadd.f32 %v4063_v41, %v5307_v1 }
 0x1d6   : > { %v2064_v45 = vmax.f32 %v2018_v38, 0.0 }
 0x1d7   : > { %v2062_v6 = vmax.f32 %v2010_v43, 0.0  ;;  %4232 = vmatprep.mubr.msk.f32.mxu1 %vm2078_vm4, %v2061_v25  ;;  %v1865_v46 = vadd.f32 %v4066_v60, %v5312_v24 }
 0x1d9   : > { %v4067_v34 = vpop.f32.mrb[108].mxu0  ;;  %v4190_v39 = vpop.f32.mrb[108].mxu1  ;;  %4233 = vmatmul.mubr.msk.f32.gmra.mrb[136].mxu1 %vm2078_vm4, %v2062_v6 }
 0x1da   : > { %v4068_v12 = vpop.f32.mrb[109].mxu0  ;;  %v2022_v54 = vpop.f32.mrb[109].mxu1  ;;  %4235 = vmatprep.mubr.msk.f32.mxu1 %vm2078_vm4, %v2063_v32 }
 0x1db   : > { %v4069_v0 = vadd.f32 %v4068_v12, %v4067_v34  ;;  %v2023_v37 = vadd.f32 %v2022_v54, %v1862_v57  ;;  %v4070_v2 = vpop.f32.mrb[110].mxu0  ;;  %v4191_v33 = vpop.f32.mrb[110].mxu1 }
 0x1dc   : > { %v4071_v1 = vpop.f32.mrb[111].mxu0  ;;  %v2025_v50 = vpop.f32.mrb[111].mxu1 }
 0x1dd   : > { %v1870_v28 = vadd.f32 %v4069_v0, %v5321_v48  ;;  %v2065_v9 = vmax.f32 %v2023_v37, 0.0  ;;  %v4072_v24 = vadd.f32 %v4071_v1, %v4070_v2  ;;  %v2026_v3 = vadd.f32 %v2025_v50, %v1865_v46  ;;  %4236 = vmatmul.mubr.msk.f32.gmra.mrb[138].mxu1 %vm2078_vm4, %v2064_v45  ;;  %v5407_v48 = vld [vmem:[%s5877_s4] ss:$0 sm:$0xff] }
 0x1df   : > { %v2031_v36 = vadd.f32 %v4190_v39, %v1870_v28  ;;  %v1873_v19 = vadd.f32 %v4072_v24, %v5326_v47  ;;  %v2066_v8 = vmax.f32 %v2026_v3, 0.0  ;;  %4238 = vmatprep.mubr.msk.f32.mxu1 %vm2078_vm4, %v2065_v9 }
 0x1e1   : > { %v2067_v11 = vmax.f32 %v2031_v36, 0.0  ;;  %v2034_v59 = vadd.f32 %v4191_v33, %v1873_v19  ;;  %4239 = vmatmul.mubr.msk.f32.gmra.mrb[140].mxu1 %vm2078_vm4, %v2066_v8 }
 0x1e3   : > { %v2068_v26 = vmax.f32 %v2034_v59, 0.0  ;;  %4241 = vmatprep.mubr.msk.f32.mxu1 %vm2078_vm4, %v2067_v11 }
 0x1e5   : > { %4242 = vmatmul.mubr.msk.f32.gmra.mrb[142].mxu1 %vm2078_vm4, %v2068_v26 }
 0x27c   : > { %v4198_v23 = vpop.f32.mrb[112].mxu1 }
 0x27d   : > { %v2245_v29 = vpop.f32.mrb[113].mxu1  ;;  %v5413_v61 = vadd.f32 %v4198_v23, %v5407_v48 }
 0x27e   : > { %v5410_v47 = vadd.f32 %v5407_v48, %v2245_v29 }
 0x27f   : > { %v2408_v21 = vsel %vm2404_vm5, %v5413_v61, -inf }
 0x280   : > { %v4201_v13 = vpop.f32.mrb[114].mxu1  ;;  %v2405_v18 = vsel %vm2404_vm5, %v5410_v47, -inf }
 0x281   : > { %v2255_v22 = vpop.f32.mrb[115].mxu1  ;;  %2406 = vmax.xlane.f32.xlu0 %v2405_v18  ;;  %v5421_v58 = vadd.f32 %v4201_v13, %v5407_v48 }
 0x282   : > { %v5418_v17 = vadd.f32 %v5407_v48, %v2255_v22 }
 0x283   : > { %v2414_v44 = vsel %vm2404_vm5, %v5421_v58, -inf }
 0x284   : > { %v4204_v27 = vpop.f32.mrb[116].mxu1  ;;  %v2411_v63 = vsel %vm2404_vm5, %v5418_v17, -inf }
 0x285   : > { %v2265_v16 = vpop.f32.mrb[117].mxu1  ;;  %2412 = vmax.xlane.f32.xlu1 %v2411_v63  ;;  %2409 = vmax.xlane.f32.xlu0 %v2408_v21  ;;  %v5431_v53 = vadd.f32 %v4204_v27, %v5407_v48 }
 0x286   : > { %v5428_v35 = vadd.f32 %v5407_v48, %v2265_v16 }
 0x287   : > { %v2420_v14 = vsel %vm2404_vm5, %v5431_v53, -inf }
 0x288   : > { %v4207_v15 = vpop.f32.mrb[118].mxu1  ;;  %v2417_v56 = vsel %vm2404_vm5, %v5428_v35, -inf }
 0x289   : > { %v2275_v20 = vpop.f32.mrb[119].mxu1  ;;  %2415 = vmax.xlane.f32.xlu1 %v2414_v44  ;;  %2418 = vmax.xlane.f32.xlu0 %v2417_v56  ;;  %v5441_v52 = vadd.f32 %v4207_v15, %v5407_v48 }
 0x28a   : > { %v5438_v4 = vadd.f32 %v5407_v48, %v2275_v20 }
 0x28b   : > { %v2426_v41 = vsel %vm2404_vm5, %v5441_v52, -inf }
 0x28c   : > { %v4210_v62 = vpop.f32.mrb[120].mxu1  ;;  %v2423_v30 = vsel %vm2404_vm5, %v5438_v4, -inf }
 0x28d   : > { %v2285_v40 = vpop.f32.mrb[121].mxu1  ;;  %2421 = vmax.xlane.f32.xlu1 %v2420_v14  ;;  %2424 = vmax.xlane.f32.xlu0 %v2423_v30  ;;  %v5451_v31 = vadd.f32 %v4210_v62, %v5407_v48 }
 0x28e   : > { %v5448_v51 = vadd.f32 %v5407_v48, %v2285_v40 }
 0x28f   : > { %v2432_v55 = vsel %vm2404_vm5, %v5451_v31, -inf }
 0x290   : > { %v4213_v10 = vpop.f32.mrb[122].mxu1  ;;  %v2429_v5 = vsel %vm2404_vm5, %v5448_v51, -inf }
 0x291   : > { %v2295_v7 = vpop.f32.mrb[123].mxu1  ;;  %2427 = vmax.xlane.f32.xlu1 %v2426_v41  ;;  %2430 = vmax.xlane.f32.xlu0 %v2429_v5  ;;  %v5461_v38 = vadd.f32 %v4213_v10, %v5407_v48 }
 0x292   : > { %v5458_v49 = vadd.f32 %v5407_v48, %v2295_v7 }
 0x293   : > { %v2438_v46 = vsel %vm2404_vm5, %v5461_v38, -inf }
 0x294   : > { %v4216_v42 = vpop.f32.mrb[124].mxu1  ;;  %v2435_v25 = vsel %vm2404_vm5, %v5458_v49, -inf }
 0x295   : > { %v2305_v60 = vpop.f32.mrb[125].mxu1  ;;  %2433 = vmax.xlane.f32.xlu1 %v2432_v55  ;;  %2436 = vmax.xlane.f32.xlu0 %v2435_v25  ;;  %v5471_v57 = vadd.f32 %v4216_v42, %v5407_v48 }
 0x296   : > { %v5468_v43 = vadd.f32 %v5407_v48, %v2305_v60 }
 0x297   : > { %v2444_v45 = vsel %vm2404_vm5, %v5471_v57, -inf }
 0x298   : > { %v4219_v6 = vpop.f32.mrb[126].mxu1  ;;  %v2441_v32 = vsel %vm2404_vm5, %v5468_v43, -inf }
 0x299   : > { %v2315_v34 = vpop.f32.mrb[127].mxu1  ;;  %2439 = vmax.xlane.f32.xlu1 %v2438_v46  ;;  %2442 = vmax.xlane.f32.xlu0 %v2441_v32  ;;  %v5481_v12 = vadd.f32 %v4219_v6, %v5407_v48 }
 0x29a   : > { %v5478_v39 = vadd.f32 %v5407_v48, %v2315_v34 }
 0x29b   : > { %v2450_v50 = vsel %vm2404_vm5, %v5481_v12, -inf }
 0x29c   : > { %v4222_v54 = vpop.f32.mrb[128].mxu1  ;;  %v2447_v0 = vsel %vm2404_vm5, %v5478_v39, -inf }
 0x29d   : > { %v2325_v37 = vpop.f32.mrb[129].mxu1  ;;  %2445 = vmax.xlane.f32.xlu1 %v2444_v45  ;;  %2448 = vmax.xlane.f32.xlu0 %v2447_v0  ;;  %v5491_v33 = vadd.f32 %v4222_v54, %v5407_v48 }
 0x29e   : > { %v5488_v2 = vadd.f32 %v5407_v48, %v2325_v37 }
 0x29f   : > { %v2456_v19 = vsel %vm2404_vm5, %v5491_v33, -inf }
 0x2a0   : > { %v4225_v1 = vpop.f32.mrb[130].mxu1  ;;  %v2453_v28 = vsel %vm2404_vm5, %v5488_v2, -inf }
 0x2a1   : > { %v2335_v9 = vpop.f32.mrb[131].mxu1  ;;  %2451 = vmax.xlane.f32.xlu1 %v2450_v50  ;;  %2454 = vmax.xlane.f32.xlu0 %v2453_v28  ;;  %v5501_v3 = vadd.f32 %v4225_v1, %v5407_v48  ;;  %v2757_v1 = vld [vmem:[%s5878_s5] sm:$0xff] }
 0x2a2   : > { %v5498_v24 = vadd.f32 %v5407_v48, %v2335_v9 }
 0x2a3   : > { %v2462_v29 = vsel %vm2404_vm5, %v5501_v3, -inf }
 0x2a4   : > { %v4228_v36 = vpop.f32.mrb[132].mxu1  ;;  %v2459_v8 = vsel %vm2404_vm5, %v5498_v24, -inf }
 0x2a5   : > { %v2345_v11 = vpop.f32.mrb[133].mxu1  ;;  %2457 = vmax.xlane.f32.xlu1 %v2456_v19  ;;  %2460 = vmax.xlane.f32.xlu0 %v2459_v8  ;;  %v5511_v26 = vadd.f32 %v4228_v36, %v5407_v48 }
 0x2a6   : > { %v5508_v59 = vadd.f32 %v5407_v48, %v2345_v11 }
 0x2a7   : > { %v2468_v21 = vsel %vm2404_vm5, %v5511_v26, -inf }
 0x2a8   : > { %v4231_v23 = vpop.f32.mrb[134].mxu1  ;;  %v2465_v13 = vsel %vm2404_vm5, %v5508_v59, -inf }
 0x2a9   : > { %v2355_v18 = vpop.f32.mrb[135].mxu1  ;;  %2463 = vmax.xlane.f32.xlu1 %v2462_v29  ;;  %2466 = vmax.xlane.f32.xlu0 %v2465_v13  ;;  %v5521_v27 = vadd.f32 %v4231_v23, %v5407_v48 }
 0x2aa   : > { %v5518_v22 = vadd.f32 %v5407_v48, %v2355_v18 }
 0x2ab   : > { %v2474_v62 = vsel %vm2404_vm5, %v5521_v27, -inf }
 0x2ac   : > { %v4234_v63 = vpop.f32.mrb[136].mxu1  ;;  %v2471_v16 = vsel %vm2404_vm5, %v5518_v22, -inf }
 0x2ad   : > { %v2365_v15 = vpop.f32.mrb[137].mxu1  ;;  %2469 = vmax.xlane.f32.xlu1 %v2468_v21  ;;  %2472 = vmax.xlane.f32.xlu0 %v2471_v16  ;;  %v5531_v56 = vadd.f32 %v4234_v63, %v5407_v48 }
 0x2ae   : > { %v5528_v44 = vadd.f32 %v5407_v48, %v2365_v15 }
 0x2af   : > { %v2480_v5 = vsel %vm2404_vm5, %v5531_v56, -inf }
 0x2b0   : > { %v4237_v20 = vpop.f32.mrb[138].mxu1  ;;  %v2477_v14 = vsel %vm2404_vm5, %v5528_v44, -inf }
 0x2b1   : > { %v2375_v30 = vpop.f32.mrb[139].mxu1  ;;  %2475 = vmax.xlane.f32.xlu1 %v2474_v62  ;;  %2478 = vmax.xlane.f32.xlu0 %v2477_v14  ;;  %v5541_v10 = vadd.f32 %v4237_v20, %v5407_v48 }
 0x2b2   : > { %v5538_v40 = vadd.f32 %v5407_v48, %v2375_v30 }
 0x2b3   : > { %v2486_v6 = vsel %vm2404_vm5, %v5541_v10, -inf }
 0x2b4   : > { %v4240_v41 = vpop.f32.mrb[140].mxu1  ;;  %v2483_v7 = vsel %vm2404_vm5, %v5538_v40, -inf }
 0x2b5   : > { %v2385_v42 = vpop.f32.mrb[141].mxu1  ;;  %2481 = vmax.xlane.f32.xlu1 %v2480_v5  ;;  %2484 = vmax.xlane.f32.xlu0 %v2483_v7  ;;  %v5551_v25 = vadd.f32 %v4240_v41, %v5407_v48 }
 0x2b6   : > { %v5548_v55 = vadd.f32 %v5407_v48, %v2385_v42 }
 0x2b7   : > { %v2492_v45 = vsel %vm2404_vm5, %v5551_v25, -inf }
 0x2b8   : > { %v4243_v60 = vpop.f32.mrb[142].mxu1  ;;  %v2489_v46 = vsel %vm2404_vm5, %v5548_v55, -inf }
 0x2b9   : > { %v5558_v32 = vadd.f32 %v4243_v60, %v5407_v48  ;;  %v2395_v34 = vpop.f32.mrb[143].mxu1  ;;  %2487 = vmax.xlane.f32.xlu1 %v2486_v6  ;;  %2490 = vmax.xlane.f32.xlu0 %v2489_v46 }
 0x2ba   : > { %v5561_v54 = vadd.f32 %v5407_v48, %v2395_v34  ;;  %v2758_v48 = vld [vmem:[%s5878_s5 + $0x8] sm:$0x3] }
 0x2bb   : > { %v2498_v37 = vsel %vm2404_vm5, %v5558_v32, -inf  ;;  %v4302_v50 = vpack.c.bf16 %v2758_v48, %v2757_v1 }
 0x2bc   : > { %v2495_v0 = vsel %vm2404_vm5, %v5561_v54, -inf }
 0x2bd   : > { %2493 = vmax.xlane.f32.xlu1 %v2492_v45  ;;  %2496 = vmax.xlane.f32.xlu0 %v2495_v0 }
 0x2be   : > { %4304 = vmatprep.subr.msk.bf16.mxu0 %vm4303_vm7, %v4302_v50 }
 0x2bf   : > { %4307 = vmatpush3.bf16.msk.msra.mxu0 %vm4303_vm7, %v4302_v50 }
 0x2c1   : > { %2499 = vmax.xlane.f32.xlu1 %v2498_v37 }
 0x30e   : > { %v2407_v28 = vpop.xlane.xlu0 %2406 }
 0x30f   : > { %v2501_v9 = vsub.f32 %v5410_v47, %v2407_v28 }
 0x311   : > { %v2533_v36 = vmul.f32 1.442695, %v2501_v9 }
 0x312   : > { %v2413_v19 = vpop.xlane.xlu1 %2412  ;;  %v2410_v8 = vpop.xlane.xlu0 %2409 }
 0x313   : > { %4576 = vpow2.f32 %v2533_v36  ;;  %v2503_v11 = vsub.f32 %v5418_v17, %v2413_v19  ;;  %v2502_v23 = vsub.f32 %v5413_v61, %v2410_v8 }
 0x315   : > { %v2537_v29 = vmul.f32 1.442695, %v2503_v11  ;;  %v2535_v13 = vmul.f32 1.442695, %v2502_v23 }
 0x316   : > { %v2416_v18 = vpop.xlane.xlu1 %2415  ;;  %v2419_v63 = vpop.xlane.xlu0 %2418 }
 0x317   : > { %4578 = vpow2.f32 %v2537_v29  ;;  %v2504_v21 = vsub.f32 %v5421_v58, %v2416_v18  ;;  %v2505_v16 = vsub.f32 %v5428_v35, %v2419_v63 }
 0x318   : > { %4580 = vpow2.f32 %v2535_v13 }
 0x319   : > { %v2539_v15 = vmul.f32 1.442695, %v2504_v21  ;;  %v2541_v47 = vmul.f32 1.442695, %v2505_v16 }
 0x31a   : > { %v2422_v20 = vpop.xlane.xlu1 %2421  ;;  %v2425_v62 = vpop.xlane.xlu0 %2424 }
 0x31b   : > { %4582 = vpow2.f32 %v2539_v15  ;;  %v2506_v14 = vsub.f32 %v5431_v53, %v2422_v20  ;;  %v2507_v17 = vsub.f32 %v5438_v4, %v2425_v62 }
 0x31c   : > { %4584 = vpow2.f32 %v2541_v47 }
 0x31d   : > { %v5583_v61 = vpop.eup %4576  ;;  %v2543_v30 = vmul.f32 1.442695, %v2506_v14  ;;  %v2545_v41 = vmul.f32 1.442695, %v2507_v17 }
 0x31e   : > { %v2428_v5 = vpop.xlane.xlu1 %2427  ;;  %v2431_v7 = vpop.xlane.xlu0 %2430  ;;  %v2597_v58 = vsel %vm2404_vm5, %v5583_v61, 0.0 }
 0x31f   : > { %4586 = vpow2.f32 %v2543_v30  ;;  %v2508_v35 = vsub.f32 %v5441_v52, %v2428_v5  ;;  %v2509_v42 = vsub.f32 %v5448_v51, %v2431_v7  ;;  %2598 = vadd.xlane.f32.xlu0 %v2597_v58 }
 0x320   : > { %4588 = vpow2.f32 %v2545_v41 }
 0x321   : > { %v5589_v53 = vpop.eup %4578  ;;  %v2547_v4 = vmul.f32 1.442695, %v2508_v35  ;;  %v2549_v60 = vmul.f32 1.442695, %v2509_v42 }
 0x322   : > { %v5591_v6 = vpop.eup %4580  ;;  %v2434_v46 = vpop.xlane.xlu1 %2433  ;;  %v2603_v45 = vsel %vm2404_vm5, %v5589_v53, 0.0 }
 0x323   : > { %v2437_v34 = vpop.xlane.xlu0 %2436  ;;  %4590 = vpow2.f32 %v2547_v4  ;;  %v2510_v0 = vsub.f32 %v5451_v31, %v2434_v46  ;;  %2604 = vadd.xlane.f32.xlu0 %v2603_v45  ;;  %v2600_v51 = vsel %vm2404_vm5, %v5591_v6, 0.0 }
 0x324   : > { %v2511_v52 = vsub.f32 %v5458_v49, %v2437_v34  ;;  %4592 = vpow2.f32 %v2549_v60  ;;  %2601 = vadd.xlane.f32.xlu1 %v2600_v51 }
 0x325   : > { %v5599_v37 = vpop.eup %4582  ;;  %v2551_v1 = vmul.f32 1.442695, %v2510_v0 }
 0x326   : > { %v2553_v48 = vmul.f32 1.442695, %v2511_v52  ;;  %v5601_v50 = vpop.eup %4584  ;;  %v2440_v28 = vpop.xlane.xlu1 %2439  ;;  %v2606_v36 = vsel %vm2404_vm5, %v5599_v37, 0.0 }
 0x327   : > { %v2443_v9 = vpop.xlane.xlu0 %2442  ;;  %4594 = vpow2.f32 %v2551_v1  ;;  %v2512_v31 = vsub.f32 %v5461_v38, %v2440_v28  ;;  %v2609_v19 = vsel %vm2404_vm5, %v5601_v50, 0.0 }
 0x328   : > { %v2513_v49 = vsub.f32 %v5468_v43, %v2443_v9  ;;  %4596 = vpow2.f32 %v2553_v48  ;;  %2607 = vadd.xlane.f32.xlu1 %v2606_v36  ;;  %2610 = vadd.xlane.f32.xlu0 %v2609_v19 }
 0x329   : > { %v5609_v8 = vpop.eup %4586  ;;  %v2555_v11 = vmul.f32 1.442695, %v2512_v31 }
 0x32a   : > { %v2557_v23 = vmul.f32 1.442695, %v2513_v49  ;;  %v5611_v29 = vpop.eup %4588  ;;  %v2446_v13 = vpop.xlane.xlu1 %2445  ;;  %v2612_v63 = vsel %vm2404_vm5, %v5609_v8, 0.0 }
 0x32b   : > { %v2449_v18 = vpop.xlane.xlu0 %2448  ;;  %4598 = vpow2.f32 %v2555_v11  ;;  %v2514_v38 = vsub.f32 %v5471_v57, %v2446_v13  ;;  %v2615_v21 = vsel %vm2404_vm5, %v5611_v29, 0.0 }
 0x32c   : > { %v2515_v43 = vsub.f32 %v5478_v39, %v2449_v18  ;;  %4600 = vpow2.f32 %v2557_v23  ;;  %2613 = vadd.xlane.f32.xlu1 %v2612_v63  ;;  %2616 = vadd.xlane.f32.xlu0 %v2615_v21 }
 0x32d   : > { %v5619_v16 = vpop.eup %4590  ;;  %v2559_v15 = vmul.f32 1.442695, %v2514_v38 }
 0x32e   : > { %v2561_v47 = vmul.f32 1.442695, %v2515_v43  ;;  %v5621_v20 = vpop.eup %4592  ;;  %v2452_v62 = vpop.xlane.xlu1 %2451  ;;  %v2618_v17 = vsel %vm2404_vm5, %v5619_v16, 0.0 }
 0x32f   : > { %v2455_v14 = vpop.xlane.xlu0 %2454  ;;  %4602 = vpow2.f32 %v2559_v15  ;;  %v2516_v57 = vsub.f32 %v5481_v12, %v2452_v62  ;;  %v2621_v30 = vsel %vm2404_vm5, %v5621_v20, 0.0 }
 0x330   : > { %v2517_v39 = vsub.f32 %v5488_v2, %v2455_v14  ;;  %4604 = vpow2.f32 %v2561_v47  ;;  %2619 = vadd.xlane.f32.xlu1 %v2618_v17  ;;  %2622 = vadd.xlane.f32.xlu0 %v2621_v30 }
 0x331   : > { %v5629_v41 = vpop.eup %4594  ;;  %v2563_v5 = vmul.f32 1.442695, %v2516_v57 }
 0x332   : > { %v2565_v7 = vmul.f32 1.442695, %v2517_v39  ;;  %v5631_v58 = vpop.eup %4596  ;;  %v2458_v35 = vpop.xlane.xlu1 %2457  ;;  %v2624_v4 = vsel %vm2404_vm5, %v5629_v41, 0.0 }
 0x333   : > { %v2461_v42 = vpop.xlane.xlu0 %2460  ;;  %4606 = vpow2.f32 %v2563_v5  ;;  %v2518_v12 = vsub.f32 %v5491_v33, %v2458_v35  ;;  %v2627_v60 = vsel %vm2404_vm5, %v5631_v58, 0.0 }
 0x334   : > { %v2519_v2 = vsub.f32 %v5498_v24, %v2461_v42  ;;  %4608 = vpow2.f32 %v2565_v7  ;;  %2625 = vadd.xlane.f32.xlu1 %v2624_v4  ;;  %2628 = vadd.xlane.f32.xlu0 %v2627_v60 }
 0x335   : > { %v5639_v46 = vpop.eup %4598  ;;  %v2567_v34 = vmul.f32 1.442695, %v2518_v12 }
 0x336   : > { %v2569_v45 = vmul.f32 1.442695, %v2519_v2  ;;  %v5641_v0 = vpop.eup %4600  ;;  %v2464_v52 = vpop.xlane.xlu1 %2463  ;;  %v2630_v1 = vsel %vm2404_vm5, %v5639_v46, 0.0 }
 0x337   : > { %v2467_v51 = vpop.xlane.xlu0 %2466  ;;  %4610 = vpow2.f32 %v2567_v34  ;;  %v2520_v33 = vsub.f32 %v5501_v3, %v2464_v52  ;;  %v2633_v48 = vsel %vm2404_vm5, %v5641_v0, 0.0 }
 0x338   : > { %v2521_v24 = vsub.f32 %v5508_v59, %v2467_v51  ;;  %4612 = vpow2.f32 %v2569_v45  ;;  %2631 = vadd.xlane.f32.xlu1 %v2630_v1  ;;  %2634 = vadd.xlane.f32.xlu0 %v2633_v48 }
 0x339   : > { %v5649_v28 = vpop.eup %4602  ;;  %v2571_v9 = vmul.f32 1.442695, %v2520_v33 }
 0x33a   : > { %v2573_v36 = vmul.f32 1.442695, %v2521_v24  ;;  %v5651_v31 = vpop.eup %4604  ;;  %v2470_v49 = vpop.xlane.xlu1 %2469  ;;  %v2636_v11 = vsel %vm2404_vm5, %v5649_v28, 0.0 }
 0x33b   : > { %v2473_v19 = vpop.xlane.xlu0 %2472  ;;  %4614 = vpow2.f32 %v2571_v9  ;;  %v2522_v3 = vsub.f32 %v5511_v26, %v2470_v49  ;;  %v2639_v23 = vsel %vm2404_vm5, %v5651_v31, 0.0 }
 0x33c   : > { %v2523_v59 = vsub.f32 %v5518_v22, %v2473_v19  ;;  %4616 = vpow2.f32 %v2573_v36  ;;  %2637 = vadd.xlane.f32.xlu1 %v2636_v11  ;;  %2640 = vadd.xlane.f32.xlu0 %v2639_v23 }
 0x33d   : > { %v5659_v13 = vpop.eup %4606  ;;  %v2575_v18 = vmul.f32 1.442695, %v2522_v3 }
 0x33e   : > { %v2577_v63 = vmul.f32 1.442695, %v2523_v59  ;;  %v5661_v38 = vpop.eup %4608  ;;  %v2476_v43 = vpop.xlane.xlu1 %2475  ;;  %v2642_v15 = vsel %vm2404_vm5, %v5659_v13, 0.0 }
 0x33f   : > { %v2479_v21 = vpop.xlane.xlu0 %2478  ;;  %4618 = vpow2.f32 %v2575_v18  ;;  %v2524_v26 = vsub.f32 %v5521_v27, %v2476_v43  ;;  %v2645_v47 = vsel %vm2404_vm5, %v5661_v38, 0.0 }
 0x340   : > { %v2525_v22 = vsub.f32 %v5528_v44, %v2479_v21  ;;  %4620 = vpow2.f32 %v2577_v63  ;;  %2643 = vadd.xlane.f32.xlu1 %v2642_v15  ;;  %2646 = vadd.xlane.f32.xlu0 %v2645_v47 }
 0x341   : > { %v5669_v62 = vpop.eup %4610  ;;  %v2579_v14 = vmul.f32 1.442695, %v2524_v26 }
 0x342   : > { %v2581_v17 = vmul.f32 1.442695, %v2525_v22  ;;  %v5671_v57 = vpop.eup %4612  ;;  %v2482_v39 = vpop.xlane.xlu1 %2481  ;;  %v2648_v5 = vsel %vm2404_vm5, %v5669_v62, 0.0 }
 0x343   : > { %v2485_v30 = vpop.xlane.xlu0 %2484  ;;  %4622 = vpow2.f32 %v2579_v14  ;;  %v2526_v27 = vsub.f32 %v5531_v56, %v2482_v39  ;;  %v2651_v7 = vsel %vm2404_vm5, %v5671_v57, 0.0 }
 0x344   : > { %v2527_v44 = vsub.f32 %v5538_v40, %v2485_v30  ;;  %4624 = vpow2.f32 %v2581_v17  ;;  %2649 = vadd.xlane.f32.xlu1 %v2648_v5  ;;  %2652 = vadd.xlane.f32.xlu0 %v2651_v7 }
 0x345   : > { %v5679_v35 = vpop.eup %4614  ;;  %v2583_v42 = vmul.f32 1.442695, %v2526_v27 }
 0x346   : > { %v2585_v4 = vmul.f32 1.442695, %v2527_v44  ;;  %v5681_v12 = vpop.eup %4616  ;;  %v2488_v2 = vpop.xlane.xlu1 %2487  ;;  %v2654_v34 = vsel %vm2404_vm5, %v5679_v35, 0.0 }
 0x347   : > { %v2491_v60 = vpop.xlane.xlu0 %2490  ;;  %4626 = vpow2.f32 %v2583_v42  ;;  %v2528_v56 = vsub.f32 %v5541_v10, %v2488_v2  ;;  %v2657_v45 = vsel %vm2404_vm5, %v5681_v12, 0.0 }
 0x348   : > { %v2529_v40 = vsub.f32 %v5548_v55, %v2491_v60  ;;  %4628 = vpow2.f32 %v2585_v4  ;;  %2655 = vadd.xlane.f32.xlu1 %v2654_v34  ;;  %2658 = vadd.xlane.f32.xlu0 %v2657_v45 }
 0x349   : > { %v5689_v52 = vpop.eup %4618  ;;  %v2587_v51 = vmul.f32 1.442695, %v2528_v56 }
 0x34a   : > { %v2589_v1 = vmul.f32 1.442695, %v2529_v40  ;;  %v5691_v33 = vpop.eup %4620  ;;  %v2494_v24 = vpop.xlane.xlu1 %2493  ;;  %v2660_v9 = vsel %vm2404_vm5, %v5689_v52, 0.0 }
 0x34b   : > { %v2497_v48 = vpop.xlane.xlu0 %2496  ;;  %4630 = vpow2.f32 %v2587_v51  ;;  %v2530_v10 = vsub.f32 %v5551_v25, %v2494_v24  ;;  %v2663_v36 = vsel %vm2404_vm5, %v5691_v33, 0.0 }
 0x34c   : > { %v2531_v55 = vsub.f32 %v5561_v54, %v2497_v48  ;;  %4632 = vpow2.f32 %v2589_v1  ;;  %2661 = vadd.xlane.f32.xlu1 %v2660_v9  ;;  %2664 = vadd.xlane.f32.xlu0 %v2663_v36 }
 0x34d   : > { %v5699_v49 = vpop.eup %4622  ;;  %v2591_v19 = vmul.f32 1.442695, %v2530_v10 }
 0x34e   : > { %v2593_v11 = vmul.f32 1.442695, %v2531_v55  ;;  %v5701_v3 = vpop.eup %4624  ;;  %v2500_v59 = vpop.xlane.xlu1 %2499  ;;  %v2666_v23 = vsel %vm2404_vm5, %v5699_v49, 0.0 }
 0x34f   : > { %4634 = vpow2.f32 %v2591_v19  ;;  %v2532_v25 = vsub.f32 %v5558_v32, %v2500_v59  ;;  %v2669_v54 = vsel %vm2404_vm5, %v5701_v3, 0.0 }
 0x350   : > { %4636 = vpow2.f32 %v2593_v11  ;;  %2667 = vadd.xlane.f32.xlu1 %v2666_v23  ;;  %2670 = vadd.xlane.f32.xlu0 %v2669_v54 }
 0x351   : > { %v5708_v18 = vpop.eup %4626  ;;  %v2595_v63 = vmul.f32 1.442695, %v2532_v25 }
 0x352   : > { %v5710_v43 = vpop.eup %4628  ;;  %v2672_v21 = vsel %vm2404_vm5, %v5708_v18, 0.0 }
 0x353   : > { %4638 = vpow2.f32 %v2595_v63  ;;  %v2675_v15 = vsel %vm2404_vm5, %v5710_v43, 0.0 }
 0x354   : > { %2673 = vadd.xlane.f32.xlu1 %v2672_v21  ;;  %2676 = vadd.xlane.f32.xlu0 %v2675_v15 }
 0x355   : > { %v5716_v32 = vpop.eup %4630 }
 0x356   : > { %v5718_v26 = vpop.eup %4632  ;;  %v2678_v22 = vsel %vm2404_vm5, %v5716_v32, 0.0 }
 0x357   : > { %v2681_v47 = vsel %vm2404_vm5, %v5718_v26, 0.0 }
 0x358   : > { %2679 = vadd.xlane.f32.xlu1 %v2678_v22  ;;  %2682 = vadd.xlane.f32.xlu0 %v2681_v47 }
 0x359   : > { %v5724_v14 = vpop.eup %4634 }
 0x35a   : > { %v5726_v17 = vpop.eup %4636  ;;  %v2684_v39 = vsel %vm2404_vm5, %v5724_v14, 0.0 }
 0x35b   : > { %v2687_v30 = vsel %vm2404_vm5, %v5726_v17, 0.0 }
 0x35c   : > { %2685 = vadd.xlane.f32.xlu1 %v2684_v39  ;;  %2688 = vadd.xlane.f32.xlu0 %v2687_v30 }
 0x35d   : > { %v5732_v5 = vpop.eup %4638 }
 0x35e   : > { %v2690_v27 = vsel %vm2404_vm5, %v5732_v5, 0.0 }
 0x360   : > { %2691 = vadd.xlane.f32.xlu1 %v2690_v27 }
 0x3ac   : > { %v2599_v44 = vpop.xlane.xlu0 %2598 }
 0x3ad   : > { %4640 = vrcp.f32 %v2599_v44 }
 0x3b0   : > { %v2605_v7 = vpop.xlane.xlu0 %2604 }
 0x3b1   : > { %v2602_v42 = vpop.xlane.xlu1 %2601  ;;  %4642 = vrcp.f32 %v2605_v7 }
 0x3b2   : > { %4644 = vrcp.f32 %v2602_v42 }
 0x3b5   : > { %v2608_v4 = vpop.xlane.xlu1 %2607  ;;  %v2611_v2 = vpop.xlane.xlu0 %2610 }
 0x3b6   : > { %4646 = vrcp.f32 %v2608_v4 }
 0x3b7   : > { %v4641_v60 = vpop.eup %4640  ;;  %4648 = vrcp.f32 %v2611_v2 }
 0x3b8   : > { %v2725_v34 = vmul.f32 %v4641_v60, %v5583_v61 }
 0x3b9   : > { %v2614_v56 = vpop.xlane.xlu1 %2613  ;;  %v2617_v40 = vpop.xlane.xlu0 %2616 }
 0x3ba   : > { %4650 = vrcp.f32 %v2614_v56  ;;  %4248 = vmatprep.mubr.msk.f32.mxu0 %vm2404_vm5, %v2725_v34 }
 0x3bb   : > { %v4643_v45 = vpop.eup %4642  ;;  %4652 = vrcp.f32 %v2617_v40 }
 0x3bc   : > { %v4645_v51 = vpop.eup %4644  ;;  %v2727_v1 = vmul.f32 %v4643_v45, %v5589_v53 }
 0x3bd   : > { %v2726_v24 = vmul.f32 %v4645_v51, %v5591_v6  ;;  %v2620_v48 = vpop.xlane.xlu1 %2619  ;;  %v2623_v9 = vpop.xlane.xlu0 %2622 }
 0x3be   : > { %4654 = vrcp.f32 %v2620_v48 }
 0x3bf   : > { %4656 = vrcp.f32 %v2623_v9  ;;  %4249 = vmatmul.mubr.msk.f32.vlgmr.msra.gmra.mrb[112].mxu0 %vm2404_vm5, %v2726_v24 }
 0x3c0   : > { %v4647_v10 = vpop.eup %4646  ;;  %4251 = vmatprep.mubr.msk.f32.mxu0 %vm2404_vm5, %v2727_v1 }
 0x3c1   : > { %v4649_v61 = vpop.eup %4648  ;;  %v2626_v55 = vpop.xlane.xlu1 %2625  ;;  %v2728_v19 = vmul.f32 %v4647_v10, %v5599_v37 }
 0x3c2   : > { %v2629_v36 = vpop.xlane.xlu0 %2628  ;;  %4658 = vrcp.f32 %v2626_v55  ;;  %v2729_v11 = vmul.f32 %v4649_v61, %v5601_v50 }
 0x3c3   : > { %4660 = vrcp.f32 %v2629_v36  ;;  %4252 = vmatmul.mubr.msk.f32.gmra.mrb[114].mxu0 %vm2404_vm5, %v2728_v19 }
 0x3c4   : > { %v4651_v53 = vpop.eup %4650  ;;  %4254 = vmatprep.mubr.msk.f32.mxu0 %vm2404_vm5, %v2729_v11 }
 0x3c5   : > { %v4653_v6 = vpop.eup %4652  ;;  %v2632_v59 = vpop.xlane.xlu1 %2631  ;;  %v2730_v25 = vmul.f32 %v4651_v53, %v5609_v8 }
 0x3c6   : > { %v2635_v23 = vpop.xlane.xlu0 %2634  ;;  %4662 = vrcp.f32 %v2632_v59  ;;  %v2731_v54 = vmul.f32 %v4653_v6, %v5611_v29 }
 0x3c7   : > { %4664 = vrcp.f32 %v2635_v23  ;;  %4255 = vmatmul.mubr.msk.f32.gmra.mrb[116].mxu0 %vm2404_vm5, %v2730_v25 }
 0x3c8   : > { %v4655_v37 = vpop.eup %4654  ;;  %4257 = vmatprep.mubr.msk.f32.mxu0 %vm2404_vm5, %v2731_v54 }
 0x3c9   : > { %v4657_v50 = vpop.eup %4656  ;;  %v2638_v63 = vpop.xlane.xlu1 %2637  ;;  %v2732_v15 = vmul.f32 %v4655_v37, %v5619_v16 }
 0x3ca   : > { %v2641_v21 = vpop.xlane.xlu0 %2640  ;;  %4666 = vrcp.f32 %v2638_v63  ;;  %v2733_v22 = vmul.f32 %v4657_v50, %v5621_v20 }
 0x3cb   : > { %4668 = vrcp.f32 %v2641_v21  ;;  %4258 = vmatmul.mubr.msk.f32.gmra.mrb[118].mxu0 %vm2404_vm5, %v2732_v15 }
 0x3cc   : > { %v4659_v8 = vpop.eup %4658  ;;  %4260 = vmatprep.mubr.msk.f32.mxu0 %vm2404_vm5, %v2733_v22 }
 0x3cd   : > { %v4661_v29 = vpop.eup %4660  ;;  %v2644_v47 = vpop.xlane.xlu1 %2643  ;;  %v2734_v30 = vmul.f32 %v4659_v8, %v5629_v41 }
 0x3ce   : > { %v2647_v39 = vpop.xlane.xlu0 %2646  ;;  %4670 = vrcp.f32 %v2644_v47  ;;  %v2735_v27 = vmul.f32 %v4661_v29, %v5631_v58 }
 0x3cf   : > { %4672 = vrcp.f32 %v2647_v39  ;;  %4261 = vmatmul.mubr.msk.f32.gmra.mrb[120].mxu0 %vm2404_vm5, %v2734_v30 }
 0x3d0   : > { %v4663_v16 = vpop.eup %4662  ;;  %4263 = vmatprep.mubr.msk.f32.mxu0 %vm2404_vm5, %v2735_v27 }
 0x3d1   : > { %v4665_v20 = vpop.eup %4664  ;;  %v2650_v44 = vpop.xlane.xlu1 %2649  ;;  %v2736_v42 = vmul.f32 %v4663_v16, %v5639_v46 }
 0x3d2   : > { %v2653_v7 = vpop.xlane.xlu0 %2652  ;;  %4674 = vrcp.f32 %v2650_v44  ;;  %v2737_v4 = vmul.f32 %v4665_v20, %v5641_v0 }
 0x3d3   : > { %4676 = vrcp.f32 %v2653_v7  ;;  %4264 = vmatmul.mubr.msk.f32.gmra.mrb[122].mxu0 %vm2404_vm5, %v2736_v42 }
 0x3d4   : > { %v4667_v41 = vpop.eup %4666  ;;  %4266 = vmatprep.mubr.msk.f32.mxu0 %vm2404_vm5, %v2737_v4 }
 0x3d5   : > { %v4669_v58 = vpop.eup %4668  ;;  %v2656_v2 = vpop.xlane.xlu1 %2655  ;;  %v2738_v34 = vmul.f32 %v4667_v41, %v5649_v28 }
 0x3d6   : > { %v2659_v60 = vpop.xlane.xlu0 %2658  ;;  %4678 = vrcp.f32 %v2656_v2  ;;  %v2739_v56 = vmul.f32 %v4669_v58, %v5651_v31 }
 0x3d7   : > { %4680 = vrcp.f32 %v2659_v60  ;;  %4267 = vmatmul.mubr.msk.f32.gmra.mrb[124].mxu0 %vm2404_vm5, %v2738_v34 }
 0x3d8   : > { %v4671_v46 = vpop.eup %4670  ;;  %4269 = vmatprep.mubr.msk.f32.mxu0 %vm2404_vm5, %v2739_v56 }
 0x3d9   : > { %v4673_v0 = vpop.eup %4672  ;;  %v2662_v40 = vpop.xlane.xlu1 %2661  ;;  %v2740_v51 = vmul.f32 %v4671_v46, %v5659_v13 }
 0x3da   : > { %v2665_v45 = vpop.xlane.xlu0 %2664  ;;  %4682 = vrcp.f32 %v2662_v40  ;;  %v2741_v1 = vmul.f32 %v4673_v0, %v5661_v38 }
 0x3db   : > { %4684 = vrcp.f32 %v2665_v45  ;;  %4270 = vmatmul.mubr.msk.f32.gmra.mrb[126].mxu0 %vm2404_vm5, %v2740_v51 }
 0x3dc   : > { %v4675_v28 = vpop.eup %4674  ;;  %4272 = vmatprep.mubr.msk.f32.mxu0 %vm2404_vm5, %v2741_v1 }
 0x3dd   : > { %v4677_v31 = vpop.eup %4676  ;;  %v2668_v24 = vpop.xlane.xlu1 %2667  ;;  %v2742_v9 = vmul.f32 %v4675_v28, %v5669_v62 }
 0x3de   : > { %v2671_v48 = vpop.xlane.xlu0 %2670  ;;  %4686 = vrcp.f32 %v2668_v24  ;;  %v2743_v10 = vmul.f32 %v4677_v31, %v5671_v57 }
 0x3df   : > { %4688 = vrcp.f32 %v2671_v48  ;;  %4273 = vmatmul.mubr.msk.f32.gmra.mrb[128].mxu0 %vm2404_vm5, %v2742_v9 }
 0x3e0   : > { %v4679_v13 = vpop.eup %4678  ;;  %4275 = vmatprep.mubr.msk.f32.mxu0 %vm2404_vm5, %v2743_v10 }
 0x3e1   : > { %v4681_v38 = vpop.eup %4680  ;;  %v2674_v61 = vpop.xlane.xlu1 %2673  ;;  %v2744_v36 = vmul.f32 %v4679_v13, %v5679_v35 }
 0x3e2   : > { %v2677_v55 = vpop.xlane.xlu0 %2676  ;;  %4690 = vrcp.f32 %v2674_v61  ;;  %v2745_v19 = vmul.f32 %v4681_v38, %v5681_v12 }
 0x3e3   : > { %4692 = vrcp.f32 %v2677_v55  ;;  %4276 = vmatmul.mubr.msk.f32.gmra.mrb[130].mxu0 %vm2404_vm5, %v2744_v36 }
 0x3e4   : > { %v4683_v62 = vpop.eup %4682  ;;  %4278 = vmatprep.mubr.msk.f32.mxu0 %vm2404_vm5, %v2745_v19 }
 0x3e5   : > { %v4685_v57 = vpop.eup %4684  ;;  %v2680_v11 = vpop.xlane.xlu1 %2679  ;;  %v2746_v6 = vmul.f32 %v4683_v62, %v5689_v52 }
 0x3e6   : > { %v2683_v53 = vpop.xlane.xlu0 %2682  ;;  %4694 = vrcp.f32 %v2680_v11  ;;  %v2747_v59 = vmul.f32 %v4685_v57, %v5691_v33 }
 0x3e7   : > { %4696 = vrcp.f32 %v2683_v53  ;;  %4279 = vmatmul.mubr.msk.f32.gmra.mrb[132].mxu0 %vm2404_vm5, %v2746_v6 }
 0x3e8   : > { %v4687_v35 = vpop.eup %4686  ;;  %4281 = vmatprep.mubr.msk.f32.mxu0 %vm2404_vm5, %v2747_v59 }
 0x3e9   : > { %v4689_v12 = vpop.eup %4688  ;;  %v2686_v23 = vpop.xlane.xlu1 %2685  ;;  %v2748_v54 = vmul.f32 %v4687_v35, %v5699_v49 }
 0x3ea   : > { %v2689_v25 = vpop.xlane.xlu0 %2688  ;;  %4698 = vrcp.f32 %v2686_v23  ;;  %v2749_v37 = vmul.f32 %v4689_v12, %v5701_v3 }
 0x3eb   : > { %4700 = vrcp.f32 %v2689_v25  ;;  %4282 = vmatmul.mubr.msk.f32.gmra.mrb[134].mxu0 %vm2404_vm5, %v2748_v54 }
 0x3ec   : > { %v4691_v52 = vpop.eup %4690  ;;  %4284 = vmatprep.mubr.msk.f32.mxu0 %vm2404_vm5, %v2749_v37 }
 0x3ed   : > { %v4693_v33 = vpop.eup %4692  ;;  %v2692_v50 = vpop.xlane.xlu1 %2691  ;;  %v2750_v63 = vmul.f32 %v4691_v52, %v5708_v18 }
 0x3ee   : > { %4702 = vrcp.f32 %v2692_v50  ;;  %v2751_v21 = vmul.f32 %v4693_v33, %v5710_v43 }
 0x3ef   : > { %4285 = vmatmul.mubr.msk.f32.gmra.mrb[136].mxu0 %vm2404_vm5, %v2750_v63 }
 0x3f0   : > { %v4695_v15 = vpop.eup %4694  ;;  %4287 = vmatprep.mubr.msk.f32.mxu0 %vm2404_vm5, %v2751_v21 }
 0x3f1   : > { %v4697_v49 = vpop.eup %4696  ;;  %v2752_v3 = vmul.f32 %v4695_v15, %v5716_v32 }
 0x3f2   : > { %v2753_v22 = vmul.f32 %v4697_v49, %v5718_v26 }
 0x3f3   : > { %4288 = vmatmul.mubr.msk.f32.gmra.mrb[138].mxu0 %vm2404_vm5, %v2752_v3 }
 0x3f4   : > { %v4699_v8 = vpop.eup %4698  ;;  %4290 = vmatprep.mubr.msk.f32.mxu0 %vm2404_vm5, %v2753_v22 }
 0x3f5   : > { %v4701_v18 = vpop.eup %4700  ;;  %v2754_v43 = vmul.f32 %v4699_v8, %v5724_v14 }
 0x3f6   : > { %v2755_v29 = vmul.f32 %v4701_v18, %v5726_v17 }
 0x3f7   : > { %4291 = vmatmul.mubr.msk.f32.gmra.mrb[140].mxu0 %vm2404_vm5, %v2754_v43 }
 0x3f8   : > { %v4703_v47 = vpop.eup %4702  ;;  %4293 = vmatprep.mubr.msk.f32.mxu0 %vm2404_vm5, %v2755_v29 }
 0x3f9   : > { %v2756_v39 = vmul.f32 %v4703_v47, %v5732_v5 }
 0x3fb   : > { %4294 = vmatmul.mubr.msk.f32.gmra.mrb[142].mxu0 %vm2404_vm5, %v2756_v39 }
 0x492   : > { %v4250_v32 = vpop.f32.mrb[112].mxu0 }
 0x493   : > { %v2925_v26 = vpop.f32.mrb[113].mxu0 }
 0x494   : > { %v3645_v30 = vpack.c.bf16 %v4250_v32, %v2925_v26 }
 0x496   : > { %3646 = vst [vmem:[%s5803_s12] sm:$0xff] %v3645_v30   ;;  %v4253_v14 = vpop.f32.mrb[114].mxu0 }
 0x497   : > { %v2935_v17 = vpop.f32.mrb[115].mxu0 }
 0x498   : > { %v3650_v27 = vpack.c.bf16 %v4253_v14, %v2935_v17 }
 0x49a   : > { %3722 = vst [vmem:[%s5803_s12 + $0x8] sm:$0xff] %v3650_v27   ;;  %v4256_v5 = vpop.f32.mrb[116].mxu0 }
 0x49b   : > { %v2945_v16 = vpop.f32.mrb[117].mxu0 }
 0x49c   : > { %v3655_v20 = vpack.c.bf16 %v4256_v5, %v2945_v16 }
 0x49e   : > { %3723 = vst [vmem:[%s5803_s12 + $0x10] sm:$0xff] %v3655_v20   ;;  %v4259_v44 = vpop.f32.mrb[118].mxu0 }
 0x49f   : > { %v2955_v7 = vpop.f32.mrb[119].mxu0 }
 0x4a0   : > { %v3660_v42 = vpack.c.bf16 %v4259_v44, %v2955_v7 }
 0x4a2   : > { %3724 = vst [vmem:[%s5803_s12 + $0x18] sm:$0xff] %v3660_v42   ;;  %v4262_v4 = vpop.f32.mrb[120].mxu0 }
 0x4a3   : > { %v2965_v41 = vpop.f32.mrb[121].mxu0 }
 0x4a4   : > { %v3665_v58 = vpack.c.bf16 %v4262_v4, %v2965_v41 }
 0x4a6   : > { %3725 = vst [vmem:[%s5803_s12 + $0x20] sm:$0xff] %v3665_v58   ;;  %v4265_v2 = vpop.f32.mrb[122].mxu0 }
 0x4a7   : > { %v2975_v60 = vpop.f32.mrb[123].mxu0 }
 0x4a8   : > { %v3670_v34 = vpack.c.bf16 %v4265_v2, %v2975_v60 }
 0x4aa   : > { %3726 = vst [vmem:[%s5803_s12 + $0x28] sm:$0xff] %v3670_v34   ;;  %v4268_v56 = vpop.f32.mrb[124].mxu0 }
 0x4ab   : > { %v2985_v46 = vpop.f32.mrb[125].mxu0 }
 0x4ac   : > { %v3675_v0 = vpack.c.bf16 %v4268_v56, %v2985_v46 }
 0x4ae   : > { %3727 = vst [vmem:[%s5803_s12 + $0x30] sm:$0xff] %v3675_v0   ;;  %v4271_v40 = vpop.f32.mrb[126].mxu0 }
 0x4af   : > { %v2995_v45 = vpop.f32.mrb[127].mxu0 }
 0x4b0   : > { %v3680_v51 = vpack.c.bf16 %v4271_v40, %v2995_v45 }
 0x4b2   : > { %3728 = vst [vmem:[%s5803_s12 + $0x38] sm:$0xff] %v3680_v51   ;;  %v4274_v1 = vpop.f32.mrb[128].mxu0 }
 0x4b3   : > { %v3005_v28 = vpop.f32.mrb[129].mxu0 }
 0x4b4   : > { %v3685_v31 = vpack.c.bf16 %v4274_v1, %v3005_v28 }
 0x4b6   : > { %3729 = vst [vmem:[%s5803_s12 + $0x40] sm:$0xff] %v3685_v31   ;;  %v4277_v24 = vpop.f32.mrb[130].mxu0 }
 0x4b7   : > { %v3015_v48 = vpop.f32.mrb[131].mxu0 }
 0x4b8   : > { %v3690_v9 = vpack.c.bf16 %v4277_v24, %v3015_v48 }
 0x4ba   : > { %3730 = vst [vmem:[%s5803_s12 + $0x48] sm:$0xff] %v3690_v9   ;;  %v4280_v10 = vpop.f32.mrb[132].mxu0 }
 0x4bb   : > { %v3025_v13 = vpop.f32.mrb[133].mxu0 }
 0x4bc   : > { %v3695_v38 = vpack.c.bf16 %v4280_v10, %v3025_v13 }
 0x4be   : > { %3731 = vst [vmem:[%s5803_s12 + $0x50] sm:$0xff] %v3695_v38   ;;  %v4283_v61 = vpop.f32.mrb[134].mxu0 }
 0x4bf   : > { %v3035_v55 = vpop.f32.mrb[135].mxu0 }
 0x4c0   : > { %v3700_v36 = vpack.c.bf16 %v4283_v61, %v3035_v55 }
 0x4c2   : > { %3732 = vst [vmem:[%s5803_s12 + $0x58] sm:$0xff] %v3700_v36   ;;  %v4286_v19 = vpop.f32.mrb[136].mxu0 }
 0x4c3   : > { %v3045_v62 = vpop.f32.mrb[137].mxu0 }
 0x4c4   : > { %v3705_v57 = vpack.c.bf16 %v4286_v19, %v3045_v62 }
 0x4c6   : > { %3733 = vst [vmem:[%s5803_s12 + $0x60] sm:$0xff] %v3705_v57   ;;  %v4289_v11 = vpop.f32.mrb[138].mxu0 }
 0x4c7   : > { %v3055_v53 = vpop.f32.mrb[139].mxu0 }
 0x4c8   : > { %v3710_v6 = vpack.c.bf16 %v4289_v11, %v3055_v53 }
 0x4ca   : > { %3734 = vst [vmem:[%s5803_s12 + $0x68] sm:$0xff] %v3710_v6   ;;  %v4292_v59 = vpop.f32.mrb[140].mxu0 }
 0x4cb   : > { %v3065_v35 = vpop.f32.mrb[141].mxu0 }
 0x4cc   : > { %v3715_v12 = vpack.c.bf16 %v4292_v59, %v3065_v35 }
 0x4ce   : > { %3735 = vst [vmem:[%s5803_s12 + $0x70] sm:$0xff] %v3715_v12   ;;  %v4295_v23 = vpop.f32.mrb[142].mxu0 }
 0x4cf   : > { %v3075_v25 = vpop.f32.mrb[143].mxu0 }
 0x4d0   : > { %v3720_v54 = vpack.c.bf16 %v4295_v23, %v3075_v25 }
 0x4d2   : > { %3736 = vst [vmem:[%s5803_s12 + $0x78] sm:$0xff] %v3720_v54  }
 0x4d3   : > { %4717 = shalt.err (!%p4714_p3)
}
 0x4d4   : > { %s4718_s26 = scalar_lea.hbm %s5825_s17, 2048  ;;  %s4722_s9 = scalar_lea.hbm %s5879_s6, 4096 }
 0x4d5   : > { %p4719_p4 = scmp.ne.s32.totalorder %s5825_s17, %s4718_s26  ;;  %p4723_p9 = scmp.lt.u32.totalorder %s5825_s17, %s5879_s6 }
 0x4d6   : > { %p4724_p10 = scmp.lt.u32.totalorder %s4722_s9, %s4718_s26  ;;  %p4726_p12 = scmp.lt.u32.totalorder %s4718_s26, %s5825_s17 }
 0x4d7   : > { %p4720_p7 = pnand %p4719_p4, %p4845_p5 }
 0x4d8   : > { %p4725_p11 = por %p4724_p10, %p4723_p9 }
 0x4d9   : > { %p4721_p8 = pneg %p4720_p7 }
 0x4da   : > { %p4727_p13 = por %p4726_p12, %p4725_p11 }
 0x4dc   : > { %p4728_p0 = pnand %p4727_p13, %p4721_p8 }
 0x4de   : > { %4731 = shalt.err (!%p4728_p0)
}
 0x4df   : > { %s4770_s13 = smov 64   ;;  %s4771_s15 = smov 4  }
 0x4e0   : > { %4325 = dma.vmem_to_hbm [thread:$0]  (%p4845_p5), %s5827_s14, 2048, %s5825_s17, %s5832_s11, %s4770_s13, %s4770_s13, %s4771_s15  }
 0x4e1 PF: > { %p4331_p1 = scmp.ge.s32.totalorder %s4766_s24, 2  ;;  %s3273_s16 = sand.u32 1, %s4754_s21  }
 0x4e2   : > { %s3274_s25 = scalar_lea.sflag [#allocation3], %s3273_s16 }
 0x4e3   : > { %p4328_p2 = pnand %p4331_p1, %p4849_p6 }
 0x4e5   : > { %4749 = dma.done.wait (!%p4328_p2), %s3274_s25, 2048  }
 0x4e6   : > { %4751 = vsyncadd (!%p4328_p2), %s3274_s25, 4294965248  ;;  %p16_p3 = scmp.ge.s32.totalorder %s4832_s27, 4   ;;  %s5882_s21 = smov %s4758_s22 }
 0x4e7   : > { %s5883_s22 = smov %s4762_s23  ;;  %s5884_s23 = smov %s4843_s30 }
 0x4e8   : > { %s5885_s24 = smov %s4832_s27  ;;  %18 = sbr.rel (!%p16_p3) target bundleno = 3 (0x3), region = 79 }
 0x4ef   :  { %3279 = vsyncpa [#allocation3], 1 }
 0x4f0   :  { %3281 = vsyncpa [#allocation3 + $0x1], 1 }

</bundles_post_ra>
